<compile_context>
chip_gen: v7x
topology: tpu7x:2x2x1
jax: 0.10.0
libtpu: 0.0.40
codegen_flags: <defaults>
</compile_context>

<pallas_src>
import jax
import jax.numpy as jnp
from jax.experimental import pallas as pl
from jax.experimental.pallas import tpu as pltpu

TAU = 2.0        # LIFNode(tau=2.0) -> charge factor 1/tau = 0.5 folded into BN affine
V_TH = 1.0       # spikingjelly default v_threshold
V_RESET = 0.0    # spikingjelly default v_reset (hard reset)
BN_EPS = 1e-5    # nn.BatchNorm1d default eps


# --------------------------------------------------------------------------- kernels
def _fc1_stats_kernel(x_ref, w_ref, h_ref, st_ref):
    """h1 = x @ w1 (bf16 operands, f32 accumulation); bf16 store + f32 per-tile stats."""
    T, tm, cin = x_ref.shape
    hdim = w_ref.shape[1]
    x2d = x_ref[...].reshape(T * tm, cin).astype(jnp.bfloat16)   # cast in-kernel
    h = jnp.dot(x2d, w_ref[...], preferred_element_type=jnp.float32)
    h_ref[...] = h.reshape(T, tm, hdim).astype(h_ref.dtype)      # bf16 intermediate
    # f32 first/second moments, computed before the bf16 downcast; direct row stores.
    st_ref[:, 0:1, :] = jnp.sum(h, axis=0, keepdims=True).reshape(1, 1, hdim)
    st_ref[:, 1:2, :] = jnp.sum(h * h, axis=0, keepdims=True).reshape(1, 1, hdim)


def _bn_lif_fc2_stats_kernel(h1_ref, sc_ref, sh_ref, w_ref, h2_ref, st_ref, spk_ref):
    """BN1-apply + LIF1 (tau=2) recurrence -> VMEM spike scratch, then one big fc2
    matmul and one stats reduction."""
    T, tm, hdim = h1_ref.shape
    cout = w_ref.shape[1]
    sc = sc_ref[...]                                  # (1, hdim); 0.5 LIF factor folded
    sh = sh_ref[...]

    def lif_step(t, v):                               # VPU-only; f32 elementwise math
        u = 0.5 * v + (h1_ref[t].astype(jnp.float32) * sc + sh)
        fired = u >= V_TH
        spk_ref[t] = fired.astype(spk_ref.dtype)      # stage spikes in VMEM (bf16)
        return jnp.where(fired, V_RESET, u)           # hard reset

    jax.lax.fori_loop(0, T, lif_step, jnp.zeros((tm, hdim), jnp.float32), unroll=True)

    # One (T*tm, hdim) @ (hdim, cout) MXU call with W2 held stationary.
    h2 = jnp.dot(spk_ref[...].reshape(T * tm, hdim), w_ref[...],
                 preferred_element_type=jnp.float32)
    h2_ref[...] = h2.reshape(T, tm, cout).astype(h2_ref.dtype)   # bf16 intermediate
    st_ref[:, 0:1, :] = jnp.sum(h2, axis=0, keepdims=True).reshape(1, 1, cout)
    st_ref[:, 1:2, :] = jnp.sum(h2 * h2, axis=0, keepdims=True).reshape(1, 1, cout)


def _bn_lif_out_kernel(h2_ref, sc_ref, sh_ref, o_ref):
    """BN2-apply + LIF2; spikes written straight into the (logical-width) output."""
    T, tm, cout = h2_ref.shape
    sc = sc_ref[...]
    sh = sh_ref[...]

    def lif_step(t, v):
        u = 0.5 * v + (h2_ref[t].astype(jnp.float32) * sc + sh)
        fired = u >= V_TH
        o_ref[t] = fired.astype(o_ref.dtype)
        return jnp.where(fired, V_RESET, u)

    jax.lax.fori_loop(0, T, lif_step, jnp.zeros((tm, cout), jnp.float32), unroll=True)


# --------------------------------------------------------------------------- helpers
def _vmem_budget_bytes():
    """Half the physical VMEM, clamped to [32, 96] MiB (v7x -> 32 MiB, v5e/v6e -> 64)."""
    try:
        cap = pltpu.get_tpu_info().vmem_capacity_bytes
    except Exception:
        cap = 64 * 1024 * 1024
    return int(min(max(cap // 2, 32 * 1024 * 1024), 96 * 1024 * 1024))


def _pick_token_tile(M, T, C, H, Cout, budget_bytes):
    """VMEM-aware token-tile pick: largest power-of-two tile that divides M, keeps the
    heaviest pass' double-buffered tiles + scratch under the budget, and (preferably)
    yields >= 2 tiles so both v7x TensorCores and the input/output pipeline are used."""
    def fits(tm):
        # pass 1: 2x f32 x-tile in, 2x bf16 h1 out, f32 matmul temp
        p1 = T * tm * (2 * C * 4 + 2 * H * 2 + H * 4)
        # pass 2: 2x bf16 h1 in, 2x bf16 h2 out, bf16 spike scratch, f32 temps
        p2 = T * tm * (2 * H * 2 + 2 * Cout * 2 + H * 2 + H * 4 + Cout * 4)
        # pass 3: 2x bf16 h2 in, 2x f32 spikes out, f32 temp
        p3 = T * tm * (2 * Cout * 2 + 2 * Cout * 4 + Cout * 4)
        weights = 2 * 2 * (C * H + H * Cout)             # double-buffered bf16 weights
        return max(p1, p2, p3) + weights + (2 << 20) <= budget_bytes

    cands = [t for t in (2048, 1024, 512, 256, 128, 64, 32, 16, 8)
             if t <= M and M % t == 0 and fits(t)]       # descending
    for tm in cands:
        if M // tm >= 2:
            return tm, M // tm
    if cands:                                            # only a single-tile fit
        return cands[0], M // cands[0]
    return M, 1                                          # tiny / odd M fallback


def _bn_scale_shift(partial_stats, gamma, beta, count):
    """Fused BN affine from per-tile (sum, sumsq); folds the LIF tau=2 charge factor.
    Note: E[x^2]-mean^2 in f32 can cancel for very large batches with large means;
    clamped to >= 0 (flagged in review, acceptable for this forward)."""
    tot = jnp.sum(partial_stats, axis=0)                 # (2, width)
    mean = tot[0:1, :] / count
    var = jnp.maximum(tot[1:2, :] / count - mean * mean, 0.0)
    scale = gamma * jax.lax.rsqrt(var + BN_EPS)
    shift = beta - mean * scale
    return 0.5 * scale, 0.5 * shift                      # LIF charge divides by tau=2


def prepare_params(params):
    """One-time weight prep: transpose + cast matmul weights to bf16, keep logical
    channel widths (no lane padding round-tripped through HBM).  Linear biases are
    dropped: training-mode BN mean subtraction cancels them exactly."""
    H, C = params["w1"].shape
    Cout = params["w2"].shape[0]
    return {
        "C": C, "H": H, "Cout": Cout,
        "w1": params["w1"].T.astype(jnp.bfloat16),       # (C, H)
        "w2": params["w2"].T.astype(jnp.bfloat16),       # (H, Cout)
        "g1": params["g1"].astype(jnp.float32).reshape(1, H),
        "be1": params["be1"].astype(jnp.float32).reshape(1, H),
        "g2": params["g2"].astype(jnp.float32).reshape(1, Cout),
        "be2": params["be2"].astype(jnp.float32).reshape(1, Cout),
    }


# --------------------------------------------------------------------------- forward
def mlp_forward(x, prep):
    """x: (T, B, N, C) float32.  Returns (T, B, N, C_out) float32 binary spikes."""
    T, B, N, C = x.shape
    assert C == prep["C"]
    H, Cout = prep["H"], prep["Cout"]
    M = B * N
    count = float(T * M)

    budget = _vmem_budget_bytes()
    tm, nt = _pick_token_tile(M, T, C, H, Cout, budget)
    cparams = pltpu.CompilerParams(
        dimension_semantics=("parallel",),               # token tiles are independent
        vmem_limit_bytes=budget,
    )

    x3 = x.reshape(T, M, C)                              # metadata reshape only

    # ---- pass 1: fc1 matmul (+ per-tile stats of h1) -------------------------
    h1, st1 = pl.pallas_call(
        _fc1_stats_kernel,
        grid=(nt,),
        in_specs=[
            pl.BlockSpec((T, tm, C), lambda i: (0, i, 0)),
            pl.BlockSpec((C, H), lambda i: (0, 0)),
        ],
        out_specs=(
            pl.BlockSpec((T, tm, H), lambda i: (0, i, 0)),
            pl.BlockSpec((1, 2, H), lambda i: (i, 0, 0)),
        ),
        out_shape=(
            jax.ShapeDtypeStruct((T, M, H), jnp.bfloat16),    # bf16 intermediate
            jax.ShapeDtypeStruct((nt, 2, H), jnp.float32),    # f32 stats
        ),
        compiler_params=cparams,
    )(x3, prep["w1"])

    sc1, sh1 = _bn_scale_shift(st1, prep["g1"], prep["be1"], count)

    # ---- pass 2: BN1 + LIF1 -> spikes (VMEM) -> one fc2 matmul (+ stats) ------
    h2, st2 = pl.pallas_call(
        _bn_lif_fc2_stats_kernel,
        grid=(nt,),
        in_specs=[
            pl.BlockSpec((T, tm, H), lambda i: (0, i, 0)),
            pl.BlockSpec((1, H), lambda i: (0, 0)),
            pl.BlockSpec((1, H), lambda i: (0, 0)),
            pl.BlockSpec((H, Cout), lambda i: (0, 0)),
        ],
        out_specs=(
            pl.BlockSpec((T, tm, Cout), lambda i: (0, i, 0)),
            pl.BlockSpec((1, 2, Cout), lambda i: (i, 0, 0)),
        ),
        out_shape=(
            jax.ShapeDtypeStruct((T, M, Cout), jnp.bfloat16),  # bf16 intermediate
            jax.ShapeDtypeStruct((nt, 2, Cout), jnp.float32),
        ),
        scratch_shapes=[pltpu.VMEM((T, tm, H), jnp.bfloat16)], # staged LIF1 spikes
        compiler_params=cparams,
    )(h1, sc1, sh1, prep["w2"])

    sc2, sh2 = _bn_scale_shift(st2, prep["g2"], prep["be2"], count)

    # ---- pass 3: BN2 + LIF2 -> output spikes (logical width, no slice pass) ---
    out = pl.pallas_call(
        _bn_lif_out_kernel,
        grid=(nt,),
        in_specs=[
            pl.BlockSpec((T, tm, Cout), lambda i: (0, i, 0)),
            pl.BlockSpec((1, Cout), lambda i: (0, 0)),
            pl.BlockSpec((1, Cout), lambda i: (0, 0)),
        ],
        out_specs=pl.BlockSpec((T, tm, Cout), lambda i: (0, i, 0)),
        out_shape=jax.ShapeDtypeStruct((T, M, Cout), jnp.float32),
        compiler_params=cparams,
    )(h2, sc2, sh2)

    return out.reshape(T, B, N, Cout)


def init_params(key, in_features, hidden_features, out_features):
    # Mirrors nn.Linear default init (uniform +-1/sqrt(fan_in)); BN gamma=1, beta=0.
    # b1/b2 kept for module fidelity but unused: training-mode BN cancels them exactly.
    k1, k2, k3, k4 = jax.random.split(key, 4)
    lim1 = 1.0 / jnp.sqrt(in_features)
    lim2 = 1.0 / jnp.sqrt(hidden_features)
    return {
        "w1": jax.random.uniform(k1, (hidden_features, in_features),
                                 jnp.float32, -lim1, lim1),
        "b1": jax.random.uniform(k2, (hidden_features,), jnp.float32, -lim1, lim1),
        "g1": jnp.ones((hidden_features,), jnp.float32),
        "be1": jnp.zeros((hidden_features,), jnp.float32),
        "w2": jax.random.uniform(k3, (out_features, hidden_features),
                                 jnp.float32, -lim2, lim2),
        "b2": jax.random.uniform(k4, (out_features,), jnp.float32, -lim2, lim2),
        "g2": jnp.ones((out_features,), jnp.float32),
        "be2": jnp.zeros((out_features,), jnp.float32),
    }


if __name__ == "__main__":
    key = jax.random.PRNGKey(0)
    kx, kp = jax.random.split(key)

    T, B, N, C = 4, 2, 16, 32
    HIDDEN = 64

    x = jax.random.normal(kx, (T, B, N, C), jnp.float32)
    params = init_params(kp, in_features=C, hidden_features=HIDDEN, out_features=C)
    prep = prepare_params(params)

    fwd = jax.jit(lambda xi: mlp_forward(xi, prep))
    out = jax.block_until_ready(fwd(x))

    assert out.shape == (T, B, N, C), out.shape
    assert out.dtype == jnp.float32
    # LIF outputs are binary spikes
    assert bool(jnp.all((out == 0.0) | (out == 1.0)))

    print("KERNEL_OK")
</pallas_src>

<mosaic_0001>
module attributes {stable_mosaic.version = 11 : i64} {
  func.func @_fc1_stats_kernel(%arg0: i32, %arg1: memref<4x16x32xf32, #tpu.memory_space<vmem>>, %arg2: memref<32x64xbf16, #tpu.memory_space<vmem>>, %arg3: memref<4x16x64xbf16, #tpu.memory_space<vmem>>, %arg4: memref<1x2x64xf32, #tpu.memory_space<vmem>>) attributes {dimension_semantics = [#tpu.dimension_semantics<parallel>], iteration_bounds = array<i64: 2>, scalar_prefetch = 0 : i64, scratch_operands = 0 : i64, tpu.core_type = #tpu.core_type<tc>, window_params = [{transform_indices = @transform_0, window_bounds = array<i64: 4, 16, 32>}, {pipeline_mode = #tpu.pipeline_mode<synchronous>, transform_indices = @transform_1, window_bounds = array<i64: 32, 64>}, {transform_indices = @transform_2, window_bounds = array<i64: 4, 16, 64>}, {transform_indices = @transform_3, window_bounds = array<i64: 1, 2, 64>}]} {
    %c0 = arith.constant 0 : index
    %c0_0 = arith.constant 0 : index
    %c0_1 = arith.constant 0 : index
    %0 = vector.load %arg1[%c0, %c0_0, %c0_1] : memref<4x16x32xf32, #tpu.memory_space<vmem>>, vector<4x16x32xf32>
    %1 = vector.shape_cast %0 : vector<4x16x32xf32> to vector<64x32xf32>
    %2 = arith.truncf %1 : vector<64x32xf32> to vector<64x32xbf16>
    %c0_2 = arith.constant 0 : index
    %c0_3 = arith.constant 0 : index
    %3 = vector.load %arg2[%c0_2, %c0_3] : memref<32x64xbf16, #tpu.memory_space<vmem>>, vector<32x64xbf16>
    %cst = arith.constant dense<0.000000e+00> : vector<64x64xf32>
    %4 = tpu.matmul %2, %3, %cst {dimension_numbers = #tpu.dot_dimension_numbers<[1], [0], [0], [1], [0, 0, 1, 1], [], []>} : vector<64x32xbf16>, vector<32x64xbf16>, vector<64x64xf32> -> vector<64x64xf32>
    %5 = vector.shape_cast %4 : vector<64x64xf32> to vector<4x16x64xf32>
    %6 = arith.truncf %5 : vector<4x16x64xf32> to vector<4x16x64xbf16>
    %c0_4 = arith.constant 0 : index
    %c0_5 = arith.constant 0 : index
    %c0_6 = arith.constant 0 : index
    %7 = vector.load %arg3[%c0_4, %c0_5, %c0_6] : memref<4x16x64xbf16, #tpu.memory_space<vmem>>, vector<4x16x64xbf16>
    tpu.vector_store %arg3[%c0_4, %c0_5, %c0_6], %6 {strides = array<i32>} : memref<4x16x64xbf16, #tpu.memory_space<vmem>>, vector<4x16x64xbf16>,
    %cst_7 = arith.constant dense<0.000000e+00> : vector<64xf32>
    %8 = vector.multi_reduction <add>, %4, %cst_7 [0] : vector<64x64xf32> to vector<64xf32>
    %9 = vector.shape_cast %8 : vector<64xf32> to vector<1x64xf32>
    %10 = vector.shape_cast %9 : vector<1x64xf32> to vector<1x1x64xf32>
    %c0_8 = arith.constant 0 : index
    %c0_9 = arith.constant 0 : index
    %c0_10 = arith.constant 0 : index
    %11 = vector.load %arg4[%c0_8, %c0_9, %c0_10] : memref<1x2x64xf32, #tpu.memory_space<vmem>>, vector<1x1x64xf32>
    tpu.vector_store %arg4[%c0_8, %c0_9, %c0_10], %10 {strides = array<i32>} : memref<1x2x64xf32, #tpu.memory_space<vmem>>, vector<1x1x64xf32>,
    %12 = arith.mulf %4, %4 : vector<64x64xf32>
    %cst_11 = arith.constant dense<0.000000e+00> : vector<64xf32>
    %13 = vector.multi_reduction <add>, %12, %cst_11 [0] : vector<64x64xf32> to vector<64xf32>
    %14 = vector.shape_cast %13 : vector<64xf32> to vector<1x64xf32>
    %15 = vector.shape_cast %14 : vector<1x64xf32> to vector<1x1x64xf32>
    %c0_12 = arith.constant 0 : index
    %c1 = arith.constant 1 : index
    %c0_13 = arith.constant 0 : index
    %16 = vector.load %arg4[%c0_12, %c1, %c0_13] : memref<1x2x64xf32, #tpu.memory_space<vmem>>, vector<1x1x64xf32>
    tpu.vector_store %arg4[%c0_12, %c1, %c0_13], %15 {strides = array<i32>} : memref<1x2x64xf32, #tpu.memory_space<vmem>>, vector<1x1x64xf32>,
    return
  }
  func.func @transform_0(%arg0: i32) -> (i32, i32, i32) {
    %c0_i32 = arith.constant 0 : i32
    %c0_i32_0 = arith.constant 0 : i32
    %c0_i32_1 = arith.constant 0 : i32
    return %c0_i32, %arg0, %c0_i32_0 : i32, i32, i32
  }
  func.func @transform_1(%arg0: i32) -> (i32, i32) {
    %c0_i32 = arith.constant 0 : i32
    %c0_i32_0 = arith.constant 0 : i32
    %c0_i32_1 = arith.constant 0 : i32
    return %c0_i32, %c0_i32_0 : i32, i32
  }
  func.func @transform_2(%arg0: i32) -> (i32, i32, i32) {
    %c0_i32 = arith.constant 0 : i32
    %c0_i32_0 = arith.constant 0 : i32
    %c0_i32_1 = arith.constant 0 : i32
    return %c0_i32, %arg0, %c0_i32_0 : i32, i32, i32
  }
  func.func @transform_3(%arg0: i32) -> (i32, i32, i32) {
    %c0_i32 = arith.constant 0 : i32
    %c0_i32_0 = arith.constant 0 : i32
    %c0_i32_1 = arith.constant 0 : i32
    return %arg0, %c0_i32, %c0_i32_0 : i32, i32, i32
  }
}

module attributes {stable_mosaic.version = 11 : i64} {
  func.func @_bn_lif_fc2_stats_kernel(%arg0: i32, %arg1: memref<4x16x64xbf16, #tpu.memory_space<vmem>>, %arg2: memref<1x64xf32, #tpu.memory_space<vmem>>, %arg3: memref<1x64xf32, #tpu.memory_space<vmem>>, %arg4: memref<64x32xbf16, #tpu.memory_space<vmem>>, %arg5: memref<4x16x32xbf16, #tpu.memory_space<vmem>>, %arg6: memref<1x2x32xf32, #tpu.memory_space<vmem>>, %arg7: memref<4x16x64xbf16, #tpu.memory_space<vmem>>) attributes {dimension_semantics = [#tpu.dimension_semantics<parallel>], iteration_bounds = array<i64: 2>, scalar_prefetch = 0 : i64, scratch_operands = 1 : i64, tpu.core_type = #tpu.core_type<tc>, window_params = [{transform_indices = @transform_0, window_bounds = array<i64: 4, 16, 64>}, {pipeline_mode = #tpu.pipeline_mode<synchronous>, transform_indices = @transform_1, window_bounds = array<i64: 1, 64>}, {pipeline_mode = #tpu.pipeline_mode<synchronous>, transform_indices = @transform_2, window_bounds = array<i64: 1, 64>}, {pipeline_mode = #tpu.pipeline_mode<synchronous>, transform_indices = @transform_3, window_bounds = array<i64: 64, 32>}, {transform_indices = @transform_4, window_bounds = array<i64: 4, 16, 32>}, {transform_indices = @transform_5, window_bounds = array<i64: 1, 2, 32>}]} {
    %c0 = arith.constant 0 : index
    %c0_0 = arith.constant 0 : index
    %0 = vector.load %arg2[%c0, %c0_0] : memref<1x64xf32, #tpu.memory_space<vmem>>, vector<1x64xf32>
    %c0_1 = arith.constant 0 : index
    %c0_2 = arith.constant 0 : index
    %1 = vector.load %arg3[%c0_1, %c0_2] : memref<1x64xf32, #tpu.memory_space<vmem>>, vector<1x64xf32>
    %cst = arith.constant 0.000000e+00 : f32
    %2 = vector.broadcast %cst : f32 to vector<16x64xf32>
    %c0_i32 = arith.constant 0 : i32
    %cst_3 = arith.constant 5.000000e-01 : f32
    %3 = vector.broadcast %cst_3 : f32 to vector<16x64xf32>
    %4 = arith.mulf %3, %2 : vector<16x64xf32>
    %5 = arith.index_cast %c0_i32 : i32 to index
    %c0_4 = arith.constant 0 : index
    %c0_5 = arith.constant 0 : index
    %6 = vector.load %arg1[%5, %c0_4, %c0_5] : memref<4x16x64xbf16, #tpu.memory_space<vmem>>, vector<1x16x64xbf16>
    %7 = vector.shape_cast %6 : vector<1x16x64xbf16> to vector<16x64xbf16>
    %8 = arith.extf %7 : vector<16x64xbf16> to vector<16x64xf32>
    %9 = vector.broadcast %0 : vector<1x64xf32> to vector<16x64xf32>
    %10 = arith.mulf %8, %9 : vector<16x64xf32>
    %11 = vector.broadcast %1 : vector<1x64xf32> to vector<16x64xf32>
    %12 = arith.addf %10, %11 : vector<16x64xf32>
    %13 = arith.addf %4, %12 : vector<16x64xf32>
    %cst_6 = arith.constant 1.000000e+00 : f32
    %14 = vector.broadcast %cst_6 : f32 to vector<16x64xf32>
    %15 = arith.cmpf oge, %13, %14 : vector<16x64xf32>
    %16 = arith.extui %15 : vector<16x64xi1> to vector<16x64xi32>
    %17 = arith.sitofp %16 : vector<16x64xi32> to vector<16x64xf32>
    %18 = arith.truncf %17 : vector<16x64xf32> to vector<16x64xbf16>
    %19 = arith.index_cast %c0_i32 : i32 to index
    %c0_7 = arith.constant 0 : index
    %c0_8 = arith.constant 0 : index
    %20 = vector.load %arg7[%19, %c0_7, %c0_8] : memref<4x16x64xbf16, #tpu.memory_space<vmem>>, vector<1x16x64xbf16>
    %21 = vector.shape_cast %20 : vector<1x16x64xbf16> to vector<16x64xbf16>
    %22 = vector.shape_cast %18 : vector<16x64xbf16> to vector<1x16x64xbf16>
    tpu.vector_store %arg7[%19, %c0_7, %c0_8], %22 {strides = array<i32>} : memref<4x16x64xbf16, #tpu.memory_space<vmem>>, vector<1x16x64xbf16>,
    %cst_9 = arith.constant 0.000000e+00 : f32
    %23 = vector.broadcast %cst_9 : f32 to vector<16x64xf32>
    %24 = arith.select %15, %23, %13 : vector<16x64xi1>, vector<16x64xf32>
    %c1_i32 = arith.constant 1 : i32
    %cst_10 = arith.constant 5.000000e-01 : f32
    %25 = vector.broadcast %cst_10 : f32 to vector<16x64xf32>
    %26 = arith.mulf %25, %24 : vector<16x64xf32>
    %27 = arith.index_cast %c1_i32 : i32 to index
    %c0_11 = arith.constant 0 : index
    %c0_12 = arith.constant 0 : index
    %28 = vector.load %arg1[%27, %c0_11, %c0_12] : memref<4x16x64xbf16, #tpu.memory_space<vmem>>, vector<1x16x64xbf16>
    %29 = vector.shape_cast %28 : vector<1x16x64xbf16> to vector<16x64xbf16>
    %30 = arith.extf %29 : vector<16x64xbf16> to vector<16x64xf32>
    %31 = vector.broadcast %0 : vector<1x64xf32> to vector<16x64xf32>
    %32 = arith.mulf %30, %31 : vector<16x64xf32>
    %33 = vector.broadcast %1 : vector<1x64xf32> to vector<16x64xf32>
    %34 = arith.addf %32, %33 : vector<16x64xf32>
    %35 = arith.addf %26, %34 : vector<16x64xf32>
    %cst_13 = arith.constant 1.000000e+00 : f32
    %36 = vector.broadcast %cst_13 : f32 to vector<16x64xf32>
    %37 = arith.cmpf oge, %35, %36 : vector<16x64xf32>
    %38 = arith.extui %37 : vector<16x64xi1> to vector<16x64xi32>
    %39 = arith.sitofp %38 : vector<16x64xi32> to vector<16x64xf32>
    %40 = arith.truncf %39 : vector<16x64xf32> to vector<16x64xbf16>
    %41 = arith.index_cast %c1_i32 : i32 to index
    %c0_14 = arith.constant 0 : index
    %c0_15 = arith.constant 0 : index
    %42 = vector.load %arg7[%41, %c0_14, %c0_15] : memref<4x16x64xbf16, #tpu.memory_space<vmem>>, vector<1x16x64xbf16>
    %43 = vector.shape_cast %42 : vector<1x16x64xbf16> to vector<16x64xbf16>
    %44 = vector.shape_cast %40 : vector<16x64xbf16> to vector<1x16x64xbf16>
    tpu.vector_store %arg7[%41, %c0_14, %c0_15], %44 {strides = array<i32>} : memref<4x16x64xbf16, #tpu.memory_space<vmem>>, vector<1x16x64xbf16>,
    %cst_16 = arith.constant 0.000000e+00 : f32
    %45 = vector.broadcast %cst_16 : f32 to vector<16x64xf32>
    %46 = arith.select %37, %45, %35 : vector<16x64xi1>, vector<16x64xf32>
    %c2_i32 = arith.constant 2 : i32
    %cst_17 = arith.constant 5.000000e-01 : f32
    %47 = vector.broadcast %cst_17 : f32 to vector<16x64xf32>
    %48 = arith.mulf %47, %46 : vector<16x64xf32>
    %49 = arith.index_cast %c2_i32 : i32 to index
    %c0_18 = arith.constant 0 : index
    %c0_19 = arith.constant 0 : index
    %50 = vector.load %arg1[%49, %c0_18, %c0_19] : memref<4x16x64xbf16, #tpu.memory_space<vmem>>, vector<1x16x64xbf16>
    %51 = vector.shape_cast %50 : vector<1x16x64xbf16> to vector<16x64xbf16>
    %52 = arith.extf %51 : vector<16x64xbf16> to vector<16x64xf32>
    %53 = vector.broadcast %0 : vector<1x64xf32> to vector<16x64xf32>
    %54 = arith.mulf %52, %53 : vector<16x64xf32>
    %55 = vector.broadcast %1 : vector<1x64xf32> to vector<16x64xf32>
    %56 = arith.addf %54, %55 : vector<16x64xf32>
    %57 = arith.addf %48, %56 : vector<16x64xf32>
    %cst_20 = arith.constant 1.000000e+00 : f32
    %58 = vector.broadcast %cst_20 : f32 to vector<16x64xf32>
    %59 = arith.cmpf oge, %57, %58 : vector<16x64xf32>
    %60 = arith.extui %59 : vector<16x64xi1> to vector<16x64xi32>
    %61 = arith.sitofp %60 : vector<16x64xi32> to vector<16x64xf32>
    %62 = arith.truncf %61 : vector<16x64xf32> to vector<16x64xbf16>
    %63 = arith.index_cast %c2_i32 : i32 to index
    %c0_21 = arith.constant 0 : index
    %c0_22 = arith.constant 0 : index
    %64 = vector.load %arg7[%63, %c0_21, %c0_22] : memref<4x16x64xbf16, #tpu.memory_space<vmem>>, vector<1x16x64xbf16>
    %65 = vector.shape_cast %64 : vector<1x16x64xbf16> to vector<16x64xbf16>
    %66 = vector.shape_cast %62 : vector<16x64xbf16> to vector<1x16x64xbf16>
    tpu.vector_store %arg7[%63, %c0_21, %c0_22], %66 {strides = array<i32>} : memref<4x16x64xbf16, #tpu.memory_space<vmem>>, vector<1x16x64xbf16>,
    %cst_23 = arith.constant 0.000000e+00 : f32
    %67 = vector.broadcast %cst_23 : f32 to vector<16x64xf32>
    %68 = arith.select %59, %67, %57 : vector<16x64xi1>, vector<16x64xf32>
    %c3_i32 = arith.constant 3 : i32
    %cst_24 = arith.constant 5.000000e-01 : f32
    %69 = vector.broadcast %cst_24 : f32 to vector<16x64xf32>
    %70 = arith.mulf %69, %68 : vector<16x64xf32>
    %71 = arith.index_cast %c3_i32 : i32 to index
    %c0_25 = arith.constant 0 : index
    %c0_26 = arith.constant 0 : index
    %72 = vector.load %arg1[%71, %c0_25, %c0_26] : memref<4x16x64xbf16, #tpu.memory_space<vmem>>, vector<1x16x64xbf16>
    %73 = vector.shape_cast %72 : vector<1x16x64xbf16> to vector<16x64xbf16>
    %74 = arith.extf %73 : vector<16x64xbf16> to vector<16x64xf32>
    %75 = vector.broadcast %0 : vector<1x64xf32> to vector<16x64xf32>
    %76 = arith.mulf %74, %75 : vector<16x64xf32>
    %77 = vector.broadcast %1 : vector<1x64xf32> to vector<16x64xf32>
    %78 = arith.addf %76, %77 : vector<16x64xf32>
    %79 = arith.addf %70, %78 : vector<16x64xf32>
    %cst_27 = arith.constant 1.000000e+00 : f32
    %80 = vector.broadcast %cst_27 : f32 to vector<16x64xf32>
    %81 = arith.cmpf oge, %79, %80 : vector<16x64xf32>
    %82 = arith.extui %81 : vector<16x64xi1> to vector<16x64xi32>
    %83 = arith.sitofp %82 : vector<16x64xi32> to vector<16x64xf32>
    %84 = arith.truncf %83 : vector<16x64xf32> to vector<16x64xbf16>
    %85 = arith.index_cast %c3_i32 : i32 to index
    %c0_28 = arith.constant 0 : index
    %c0_29 = arith.constant 0 : index
    %86 = vector.load %arg7[%85, %c0_28, %c0_29] : memref<4x16x64xbf16, #tpu.memory_space<vmem>>, vector<1x16x64xbf16>
    %87 = vector.shape_cast %86 : vector<1x16x64xbf16> to vector<16x64xbf16>
    %88 = vector.shape_cast %84 : vector<16x64xbf16> to vector<1x16x64xbf16>
    tpu.vector_store %arg7[%85, %c0_28, %c0_29], %88 {strides = array<i32>} : memref<4x16x64xbf16, #tpu.memory_space<vmem>>, vector<1x16x64xbf16>,
    %cst_30 = arith.constant 0.000000e+00 : f32
    %89 = vector.broadcast %cst_30 : f32 to vector<16x64xf32>
    %90 = arith.select %81, %89, %79 : vector<16x64xi1>, vector<16x64xf32>
    %c4_i32 = arith.constant 4 : i32
    %c0_31 = arith.constant 0 : index
    %c0_32 = arith.constant 0 : index
    %c0_33 = arith.constant 0 : index
    %91 = vector.load %arg7[%c0_31, %c0_32, %c0_33] : memref<4x16x64xbf16, #tpu.memory_space<vmem>>, vector<4x16x64xbf16>
    %92 = vector.shape_cast %91 : vector<4x16x64xbf16> to vector<64x64xbf16>
    %c0_34 = arith.constant 0 : index
    %c0_35 = arith.constant 0 : index
    %93 = vector.load %arg4[%c0_34, %c0_35] : memref<64x32xbf16, #tpu.memory_space<vmem>>, vector<64x32xbf16>
    %cst_36 = arith.constant dense<0.000000e+00> : vector<64x32xf32>
    %94 = tpu.matmul %92, %93, %cst_36 {dimension_numbers = #tpu.dot_dimension_numbers<[1], [0], [0], [1], [0, 0, 1, 1], [], []>} : vector<64x64xbf16>, vector<64x32xbf16>, vector<64x32xf32> -> vector<64x32xf32>
    %95 = vector.shape_cast %94 : vector<64x32xf32> to vector<4x16x32xf32>
    %96 = arith.truncf %95 : vector<4x16x32xf32> to vector<4x16x32xbf16>
    %c0_37 = arith.constant 0 : index
    %c0_38 = arith.constant 0 : index
    %c0_39 = arith.constant 0 : index
    %97 = vector.load %arg5[%c0_37, %c0_38, %c0_39] : memref<4x16x32xbf16, #tpu.memory_space<vmem>>, vector<4x16x32xbf16>
    tpu.vector_store %arg5[%c0_37, %c0_38, %c0_39], %96 {strides = array<i32>} : memref<4x16x32xbf16, #tpu.memory_space<vmem>>, vector<4x16x32xbf16>,
    %cst_40 = arith.constant dense<0.000000e+00> : vector<32xf32>
    %98 = vector.multi_reduction <add>, %94, %cst_40 [0] : vector<64x32xf32> to vector<32xf32>
    %99 = vector.shape_cast %98 : vector<32xf32> to vector<1x32xf32>
    %100 = vector.shape_cast %99 : vector<1x32xf32> to vector<1x1x32xf32>
    %c0_41 = arith.constant 0 : index
    %c0_42 = arith.constant 0 : index
    %c0_43 = arith.constant 0 : index
    %101 = vector.load %arg6[%c0_41, %c0_42, %c0_43] : memref<1x2x32xf32, #tpu.memory_space<vmem>>, vector<1x1x32xf32>
    tpu.vector_store %arg6[%c0_41, %c0_42, %c0_43], %100 {strides = array<i32>} : memref<1x2x32xf32, #tpu.memory_space<vmem>>, vector<1x1x32xf32>,
    %102 = arith.mulf %94, %94 : vector<64x32xf32>
    %cst_44 = arith.constant dense<0.000000e+00> : vector<32xf32>
    %103 = vector.multi_reduction <add>, %102, %cst_44 [0] : vector<64x32xf32> to vector<32xf32>
    %104 = vector.shape_cast %103 : vector<32xf32> to vector<1x32xf32>
    %105 = vector.shape_cast %104 : vector<1x32xf32> to vector<1x1x32xf32>
    %c0_45 = arith.constant 0 : index
    %c1 = arith.constant 1 : index
    %c0_46 = arith.constant 0 : index
    %106 = vector.load %arg6[%c0_45, %c1, %c0_46] : memref<1x2x32xf32, #tpu.memory_space<vmem>>, vector<1x1x32xf32>
    tpu.vector_store %arg6[%c0_45, %c1, %c0_46], %105 {strides = array<i32>} : memref<1x2x32xf32, #tpu.memory_space<vmem>>, vector<1x1x32xf32>,
    return
  }
  func.func @transform_0(%arg0: i32) -> (i32, i32, i32) {
    %c0_i32 = arith.constant 0 : i32
    %c0_i32_0 = arith.constant 0 : i32
    %c0_i32_1 = arith.constant 0 : i32
    return %c0_i32, %arg0, %c0_i32_0 : i32, i32, i32
  }
  func.func @transform_1(%arg0: i32) -> (i32, i32) {
    %c0_i32 = arith.constant 0 : i32
    %c0_i32_0 = arith.constant 0 : i32
    %c0_i32_1 = arith.constant 0 : i32
    return %c0_i32, %c0_i32_0 : i32, i32
  }
  func.func @transform_2(%arg0: i32) -> (i32, i32) {
    %c0_i32 = arith.constant 0 : i32
    %c0_i32_0 = arith.constant 0 : i32
    %c0_i32_1 = arith.constant 0 : i32
    return %c0_i32, %c0_i32_0 : i32, i32
  }
  func.func @transform_3(%arg0: i32) -> (i32, i32) {
    %c0_i32 = arith.constant 0 : i32
    %c0_i32_0 = arith.constant 0 : i32
    %c0_i32_1 = arith.constant 0 : i32
    return %c0_i32, %c0_i32_0 : i32, i32
  }
  func.func @transform_4(%arg0: i32) -> (i32, i32, i32) {
    %c0_i32 = arith.constant 0 : i32
    %c0_i32_0 = arith.constant 0 : i32
    %c0_i32_1 = arith.constant 0 : i32
    return %c0_i32, %arg0, %c0_i32_0 : i32, i32, i32
  }
  func.func @transform_5(%arg0: i32) -> (i32, i32, i32) {
    %c0_i32 = arith.constant 0 : i32
    %c0_i32_0 = arith.constant 0 : i32
    %c0_i32_1 = arith.constant 0 : i32
    return %arg0, %c0_i32, %c0_i32_0 : i32, i32, i32
  }
}

module attributes {stable_mosaic.version = 11 : i64} {
  func.func @_bn_lif_out_kernel(%arg0: i32, %arg1: memref<4x16x32xbf16, #tpu.memory_space<vmem>>, %arg2: memref<1x32xf32, #tpu.memory_space<vmem>>, %arg3: memref<1x32xf32, #tpu.memory_space<vmem>>, %arg4: memref<4x16x32xf32, #tpu.memory_space<vmem>>) attributes {dimension_semantics = [#tpu.dimension_semantics<parallel>], iteration_bounds = array<i64: 2>, scalar_prefetch = 0 : i64, scratch_operands = 0 : i64, tpu.core_type = #tpu.core_type<tc>, window_params = [{transform_indices = @transform_0, window_bounds = array<i64: 4, 16, 32>}, {pipeline_mode = #tpu.pipeline_mode<synchronous>, transform_indices = @transform_1, window_bounds = array<i64: 1, 32>}, {pipeline_mode = #tpu.pipeline_mode<synchronous>, transform_indices = @transform_2, window_bounds = array<i64: 1, 32>}, {transform_indices = @transform_3, window_bounds = array<i64: 4, 16, 32>}]} {
    %c0 = arith.constant 0 : index
    %c0_0 = arith.constant 0 : index
    %0 = vector.load %arg2[%c0, %c0_0] : memref<1x32xf32, #tpu.memory_space<vmem>>, vector<1x32xf32>
    %c0_1 = arith.constant 0 : index
    %c0_2 = arith.constant 0 : index
    %1 = vector.load %arg3[%c0_1, %c0_2] : memref<1x32xf32, #tpu.memory_space<vmem>>, vector<1x32xf32>
    %cst = arith.constant 0.000000e+00 : f32
    %2 = vector.broadcast %cst : f32 to vector<16x32xf32>
    %c0_i32 = arith.constant 0 : i32
    %cst_3 = arith.constant 5.000000e-01 : f32
    %3 = vector.broadcast %cst_3 : f32 to vector<16x32xf32>
    %4 = arith.mulf %3, %2 : vector<16x32xf32>
    %5 = arith.index_cast %c0_i32 : i32 to index
    %c0_4 = arith.constant 0 : index
    %c0_5 = arith.constant 0 : index
    %6 = vector.load %arg1[%5, %c0_4, %c0_5] : memref<4x16x32xbf16, #tpu.memory_space<vmem>>, vector<1x16x32xbf16>
    %7 = vector.shape_cast %6 : vector<1x16x32xbf16> to vector<16x32xbf16>
    %8 = arith.extf %7 : vector<16x32xbf16> to vector<16x32xf32>
    %9 = vector.broadcast %0 : vector<1x32xf32> to vector<16x32xf32>
    %10 = arith.mulf %8, %9 : vector<16x32xf32>
    %11 = vector.broadcast %1 : vector<1x32xf32> to vector<16x32xf32>
    %12 = arith.addf %10, %11 : vector<16x32xf32>
    %13 = arith.addf %4, %12 : vector<16x32xf32>
    %cst_6 = arith.constant 1.000000e+00 : f32
    %14 = vector.broadcast %cst_6 : f32 to vector<16x32xf32>
    %15 = arith.cmpf oge, %13, %14 : vector<16x32xf32>
    %16 = arith.extui %15 : vector<16x32xi1> to vector<16x32xi32>
    %17 = arith.sitofp %16 : vector<16x32xi32> to vector<16x32xf32>
    %18 = arith.index_cast %c0_i32 : i32 to index
    %c0_7 = arith.constant 0 : index
    %c0_8 = arith.constant 0 : index
    %19 = vector.load %arg4[%18, %c0_7, %c0_8] : memref<4x16x32xf32, #tpu.memory_space<vmem>>, vector<1x16x32xf32>
    %20 = vector.shape_cast %19 : vector<1x16x32xf32> to vector<16x32xf32>
    %21 = vector.shape_cast %17 : vector<16x32xf32> to vector<1x16x32xf32>
    tpu.vector_store %arg4[%18, %c0_7, %c0_8], %21 {strides = array<i32>} : memref<4x16x32xf32, #tpu.memory_space<vmem>>, vector<1x16x32xf32>,
    %cst_9 = arith.constant 0.000000e+00 : f32
    %22 = vector.broadcast %cst_9 : f32 to vector<16x32xf32>
    %23 = arith.select %15, %22, %13 : vector<16x32xi1>, vector<16x32xf32>
    %c1_i32 = arith.constant 1 : i32
    %cst_10 = arith.constant 5.000000e-01 : f32
    %24 = vector.broadcast %cst_10 : f32 to vector<16x32xf32>
    %25 = arith.mulf %24, %23 : vector<16x32xf32>
    %26 = arith.index_cast %c1_i32 : i32 to index
    %c0_11 = arith.constant 0 : index
    %c0_12 = arith.constant 0 : index
    %27 = vector.load %arg1[%26, %c0_11, %c0_12] : memref<4x16x32xbf16, #tpu.memory_space<vmem>>, vector<1x16x32xbf16>
    %28 = vector.shape_cast %27 : vector<1x16x32xbf16> to vector<16x32xbf16>
    %29 = arith.extf %28 : vector<16x32xbf16> to vector<16x32xf32>
    %30 = vector.broadcast %0 : vector<1x32xf32> to vector<16x32xf32>
    %31 = arith.mulf %29, %30 : vector<16x32xf32>
    %32 = vector.broadcast %1 : vector<1x32xf32> to vector<16x32xf32>
    %33 = arith.addf %31, %32 : vector<16x32xf32>
    %34 = arith.addf %25, %33 : vector<16x32xf32>
    %cst_13 = arith.constant 1.000000e+00 : f32
    %35 = vector.broadcast %cst_13 : f32 to vector<16x32xf32>
    %36 = arith.cmpf oge, %34, %35 : vector<16x32xf32>
    %37 = arith.extui %36 : vector<16x32xi1> to vector<16x32xi32>
    %38 = arith.sitofp %37 : vector<16x32xi32> to vector<16x32xf32>
    %39 = arith.index_cast %c1_i32 : i32 to index
    %c0_14 = arith.constant 0 : index
    %c0_15 = arith.constant 0 : index
    %40 = vector.load %arg4[%39, %c0_14, %c0_15] : memref<4x16x32xf32, #tpu.memory_space<vmem>>, vector<1x16x32xf32>
    %41 = vector.shape_cast %40 : vector<1x16x32xf32> to vector<16x32xf32>
    %42 = vector.shape_cast %38 : vector<16x32xf32> to vector<1x16x32xf32>
    tpu.vector_store %arg4[%39, %c0_14, %c0_15], %42 {strides = array<i32>} : memref<4x16x32xf32, #tpu.memory_space<vmem>>, vector<1x16x32xf32>,
    %cst_16 = arith.constant 0.000000e+00 : f32
    %43 = vector.broadcast %cst_16 : f32 to vector<16x32xf32>
    %44 = arith.select %36, %43, %34 : vector<16x32xi1>, vector<16x32xf32>
    %c2_i32 = arith.constant 2 : i32
    %cst_17 = arith.constant 5.000000e-01 : f32
    %45 = vector.broadcast %cst_17 : f32 to vector<16x32xf32>
    %46 = arith.mulf %45, %44 : vector<16x32xf32>
    %47 = arith.index_cast %c2_i32 : i32 to index
    %c0_18 = arith.constant 0 : index
    %c0_19 = arith.constant 0 : index
    %48 = vector.load %arg1[%47, %c0_18, %c0_19] : memref<4x16x32xbf16, #tpu.memory_space<vmem>>, vector<1x16x32xbf16>
    %49 = vector.shape_cast %48 : vector<1x16x32xbf16> to vector<16x32xbf16>
    %50 = arith.extf %49 : vector<16x32xbf16> to vector<16x32xf32>
    %51 = vector.broadcast %0 : vector<1x32xf32> to vector<16x32xf32>
    %52 = arith.mulf %50, %51 : vector<16x32xf32>
    %53 = vector.broadcast %1 : vector<1x32xf32> to vector<16x32xf32>
    %54 = arith.addf %52, %53 : vector<16x32xf32>
    %55 = arith.addf %46, %54 : vector<16x32xf32>
    %cst_20 = arith.constant 1.000000e+00 : f32
    %56 = vector.broadcast %cst_20 : f32 to vector<16x32xf32>
    %57 = arith.cmpf oge, %55, %56 : vector<16x32xf32>
    %58 = arith.extui %57 : vector<16x32xi1> to vector<16x32xi32>
    %59 = arith.sitofp %58 : vector<16x32xi32> to vector<16x32xf32>
    %60 = arith.index_cast %c2_i32 : i32 to index
    %c0_21 = arith.constant 0 : index
    %c0_22 = arith.constant 0 : index
    %61 = vector.load %arg4[%60, %c0_21, %c0_22] : memref<4x16x32xf32, #tpu.memory_space<vmem>>, vector<1x16x32xf32>
    %62 = vector.shape_cast %61 : vector<1x16x32xf32> to vector<16x32xf32>
    %63 = vector.shape_cast %59 : vector<16x32xf32> to vector<1x16x32xf32>
    tpu.vector_store %arg4[%60, %c0_21, %c0_22], %63 {strides = array<i32>} : memref<4x16x32xf32, #tpu.memory_space<vmem>>, vector<1x16x32xf32>,
    %cst_23 = arith.constant 0.000000e+00 : f32
    %64 = vector.broadcast %cst_23 : f32 to vector<16x32xf32>
    %65 = arith.select %57, %64, %55 : vector<16x32xi1>, vector<16x32xf32>
    %c3_i32 = arith.constant 3 : i32
    %cst_24 = arith.constant 5.000000e-01 : f32
    %66 = vector.broadcast %cst_24 : f32 to vector<16x32xf32>
    %67 = arith.mulf %66, %65 : vector<16x32xf32>
    %68 = arith.index_cast %c3_i32 : i32 to index
    %c0_25 = arith.constant 0 : index
    %c0_26 = arith.constant 0 : index
    %69 = vector.load %arg1[%68, %c0_25, %c0_26] : memref<4x16x32xbf16, #tpu.memory_space<vmem>>, vector<1x16x32xbf16>
    %70 = vector.shape_cast %69 : vector<1x16x32xbf16> to vector<16x32xbf16>
    %71 = arith.extf %70 : vector<16x32xbf16> to vector<16x32xf32>
    %72 = vector.broadcast %0 : vector<1x32xf32> to vector<16x32xf32>
    %73 = arith.mulf %71, %72 : vector<16x32xf32>
    %74 = vector.broadcast %1 : vector<1x32xf32> to vector<16x32xf32>
    %75 = arith.addf %73, %74 : vector<16x32xf32>
    %76 = arith.addf %67, %75 : vector<16x32xf32>
    %cst_27 = arith.constant 1.000000e+00 : f32
    %77 = vector.broadcast %cst_27 : f32 to vector<16x32xf32>
    %78 = arith.cmpf oge, %76, %77 : vector<16x32xf32>
    %79 = arith.extui %78 : vector<16x32xi1> to vector<16x32xi32>
    %80 = arith.sitofp %79 : vector<16x32xi32> to vector<16x32xf32>
    %81 = arith.index_cast %c3_i32 : i32 to index
    %c0_28 = arith.constant 0 : index
    %c0_29 = arith.constant 0 : index
    %82 = vector.load %arg4[%81, %c0_28, %c0_29] : memref<4x16x32xf32, #tpu.memory_space<vmem>>, vector<1x16x32xf32>
    %83 = vector.shape_cast %82 : vector<1x16x32xf32> to vector<16x32xf32>
    %84 = vector.shape_cast %80 : vector<16x32xf32> to vector<1x16x32xf32>
    tpu.vector_store %arg4[%81, %c0_28, %c0_29], %84 {strides = array<i32>} : memref<4x16x32xf32, #tpu.memory_space<vmem>>, vector<1x16x32xf32>,
    %cst_30 = arith.constant 0.000000e+00 : f32
    %85 = vector.broadcast %cst_30 : f32 to vector<16x32xf32>
    %86 = arith.select %78, %85, %76 : vector<16x32xi1>, vector<16x32xf32>
    %c4_i32 = arith.constant 4 : i32
    return
  }
  func.func @transform_0(%arg0: i32) -> (i32, i32, i32) {
    %c0_i32 = arith.constant 0 : i32
    %c0_i32_0 = arith.constant 0 : i32
    %c0_i32_1 = arith.constant 0 : i32
    return %c0_i32, %arg0, %c0_i32_0 : i32, i32, i32
  }
  func.func @transform_1(%arg0: i32) -> (i32, i32) {
    %c0_i32 = arith.constant 0 : i32
    %c0_i32_0 = arith.constant 0 : i32
    %c0_i32_1 = arith.constant 0 : i32
    return %c0_i32, %c0_i32_0 : i32, i32
  }
  func.func @transform_2(%arg0: i32) -> (i32, i32) {
    %c0_i32 = arith.constant 0 : i32
    %c0_i32_0 = arith.constant 0 : i32
    %c0_i32_1 = arith.constant 0 : i32
    return %c0_i32, %c0_i32_0 : i32, i32
  }
  func.func @transform_3(%arg0: i32) -> (i32, i32, i32) {
    %c0_i32 = arith.constant 0 : i32
    %c0_i32_0 = arith.constant 0 : i32
    %c0_i32_1 = arith.constant 0 : i32
    return %c0_i32, %arg0, %c0_i32_0 : i32, i32, i32
  }
}

</mosaic_0001>

<bundles_post_ra>
// kernel: _lambda_.3
= control target key start
LH: loop header
LB: loop body
LE: loop exit
PB: predicated region body
PF: predicated region fallthrough
CT: control target
= control target key end

     0   :  { %9 = vsyncpa [#allocation3], 0  ;;  %s923_s0 = inlined_call_operand.hbm [shape: f32[4,32,32], index: 0, kind: input, shape index: {}]   ;;  %s924_s1 = inlined_call_operand.vmem [shape: bf16[32,64], index: 1, kind: input, shape index: {}]   ;;  %s925_s2 = inlined_call_operand.vmem [shape: bf16[4,32,64], index: 2, kind: output, shape index: {0}]   ;;  %s926_s3 = inlined_call_operand.vmem [shape: f32[2,2,64], index: 3, kind: output, shape index: {1}]  }
   0x1   :  { %11 = vsyncpa [#allocation3 + $0x1], 0  ;;  %s769_s12 = smov 0   ;;  %s771_s13 = smov 0  }
   0x2   :  { %s773_s14 = smov 0   ;;  %s775_s15 = smov 0  }
   0x3 LB: > { %s788_s16 = sadd.s32 4294967295, %s741_s15   ;;  %s791_s17 = sadd.s32 1, %s741_s15   ;;  %s741_s15 = sphi %s775_s15, %s933_s15   ;;  %s737_s14 = sphi %s773_s14, %s932_s14   ;;  %s733_s13 = sphi %s771_s13, %s931_s13   ;;  %s729_s12 = sphi %s769_s12, %s930_s12  }
   0x4   : > { %s21_s18 = ssub.s32 %s741_s15, %s791_s17  ;;  %s24_s19 = sadd.s32 1, %s737_s14 }
   0x5   : > { %p22_p0 = scmp.eq.s32.totalorder %s21_s18, 0  ;;  %p31_p1 = scmp.ne.s32.totalorder %s737_s14, %s733_s13 }
   0x6   : > { %p32_p2 = scmp.eq.s32.totalorder %s741_s15, 0  ;;  %p37_p3 = scmp.ne.s32.totalorder %s733_s13, %s729_s12 }
   0x7   : > { %s801_s20 = scalar_select %p22_p0, %s737_s14, %s24_s19  }
   0x8   : > { %p803_p4 = por %p32_p2, %p31_p1  ;;  %p38_p5 = scmp.eq.s32.totalorder %s788_s16, 0 }
   0x9   : > { %p82_p6 = scmp.eq.s32.totalorder %s788_s16, 1  ;;  %p597_p9 = scmp.ge.s32.totalorder %s741_s15, 2 }
   0xa   : > { %p809_p7 = por %p38_p5, %p37_p3 }
   0xb   : > { %p813_p8 = por %p82_p6, %p31_p1  ;;  %133 = sbr.rel (%p597_p9) target bundleno = 31 (0x1f), region = 20 }
  0x12   : > { %s137_s24 = sand.u32 1, %s737_s14   ;;  %s626_s25 = sshll.u32 %s741_s15, 8 }
  0x13   : > { %s598_s26 = sshll.u32 %s137_s24, 6  ;;  %s147_s29 = scalar_lea.hbm %s923_s0, %s626_s25 }
  0x14   : > { %s658_s30 = scalar_select %p803_p4, [#allocation0], [#allocation7] }
  0x15   : > { %s141_s4 = scalar_lea.vmem [#allocation2], %s598_s26  ;;  %s743_s7 = smov 512  }
  0x16   : > { %s160_s5 = sshll.u32 %s141_s4, 4  ;;  %s152_s6 = sld [smem:[%s658_s30]]   ;;  %s161_s5 = int_to_ptr.vmem [resolvable:$true] %s160_s5 }
  0x17   : > { %659 = sst [smem:[#allocation6]] (%p803_p4), %s743_s7  ;;  %s744_s8 = smov 256  }
  0x18   : > { %660 = sst [smem:[#allocation6 + $0x1]] (%p803_p4), %s744_s8  ;;  %s745_s9 = smov 2  }
  0x19   : > { %661 = sst [smem:[#allocation6 + $0x2]] (%p803_p4), %s745_s9  ;;  %s746_s10 = smov 128  }
  0x1a   : > { %662 = sst [smem:[#allocation6 + $0x3]] (%p803_p4), %s746_s10  ;;  %s747_s12 = smov 8  }
  0x1b   : > { %663 = sst [smem:[#allocation6 + $0x4]] (%p803_p4), %s746_s10  ;;  %s138_s19 = scalar_lea.sflag [#allocation3], %s137_s24 }
  0x1c   : > { %s601_s11 = sshll.u32 %s152_s6, 26  ;;  %664 = sst [smem:[#allocation6 + $0x5]] (%p803_p4), %s747_s12 }
  0x1d   : > { %s602_s18 = sadd.s32 134217728, %s601_s11  ;;  %s748_s25 = smov [#allocation5]  }
  0x1e   : > { %665 = dma.general (%p803_p4), %s147_s29, 1024, %s161_s5, %s138_s19, %s748_s25, [#allocation6], %s602_s18, 0  }
  0x1f PF: > { %p603_p10 = scmp.ge.s32.totalorder %s741_s15, 1  ;;  %p181_p11 = scmp.lt.s32.totalorder %s741_s15, 3 }
  0x21   : > { %p182_p12 = pnand %p603_p10, %p181_p11 }
  0x22   : > { %s842_s26 = sand.u32 (!%p182_p12), 1, %s733_s13  }
  0x23   : > { %185 = sbr.rel (%p182_p12) target bundleno = 297 (0x129), region = 28  ;;  %s604_s27 = sshll.u32 (!%p182_p12), %s842_s26, 6 }
  0x24   : > { %s188_s28 = scalar_lea.sflag (!%p182_p12), [#allocation3], %s842_s26  ;;  %s191_s30 = scalar_lea.vmem (!%p182_p12), [#allocation2], %s604_s27 }
  0x2a   : > { %724 = dma.done.wait (%p809_p7), %s188_s28, 1024  }
  0x2b   : > { %726 = vsyncadd (%p809_p7), %s188_s28, 4294966272  ;;  %v705_v0 = vld [vmem:[%s924_s1] sm:$0xff]   ;;  %v706_v1 = vld [vmem:[%s924_s1 + $0x8] sm:$0xff]   ;;  %vm252_vm0 = vcmask 261120   ;;  %s605_s22 = sshll.u32 %s842_s26, 5  ;;  %vm362_vm1 = vcmask 519168  }
  0x2c   : > { %642 = vmatprep.subr.bf16.mxu0 %v705_v0  ;;  %654 = vmatprep.subr.bf16.mxu1 %v705_v0  ;;  %v224_v2 = vld [vmem:[%s191_s30] sm:$0xff]  ;;  %v225_v3 = vld [vmem:[%s191_s30 + $0x8] sm:$0xff]  ;;  %v226_v4 = vld [vmem:[%s191_s30 + $0x10] sm:$0xff]  ;;  %vm371_vm2 = vcmask 523264   ;;  %s861_s4 = scalar_lea.vmem [#allocation4], %s605_s22  ;;  %p219_p13 = scmp.lt.s32.totalorder %s788_s16, 1 }
  0x2d   : > { %643 = vmatpush3.bf16.msra.mxu0 %v705_v0  ;;  %656 = vmatpush3.bf16.msra.mxu1 %v705_v0  ;;  %v232_v5 = vpack.c.bf16 %v225_v3, %v224_v2  ;;  %v227_v6 = vld [vmem:[%s191_s30 + $0x18] sm:$0xff]  ;;  %v228_v7 = vld [vmem:[%s191_s30 + $0x20] sm:$0xff]  ;;  %v229_v8 = vld [vmem:[%s191_s30 + $0x28] sm:$0xff]  ;;  %vm393_vm3 = vcmask 516096   ;;  %s635_s10 = sshll.u32 (%p813_p8), %s788_s16, 3 }
  0x2e   : > { %644 = vmatprep.subr.bf16.mxu0 %v706_v1  ;;  %655 = vmatprep.subr.bf16.mxu1 %v706_v1  ;;  %v234_v9 = vpack.c.bf16 %v229_v8, %v228_v7  ;;  %v230_v10 = vld [vmem:[%s191_s30 + $0x30] sm:$0xff]  ;;  %v231_v11 = vld [vmem:[%s191_s30 + $0x38] sm:$0xff]  ;;  %v233_v12 = vpack.c.bf16 %v227_v6, %v226_v4  ;;  %s220_s5 = scalar_select %p219_p13, %s788_s16, 1 }
  0x2f   : > { %646 = vmatprep.mubr.msk.bf16.mxu0 %vm252_vm0, %v232_v5  ;;  %v235_v13 = vpack.c.bf16 %v231_v11, %v230_v10  ;;  %s438_s18 = scalar_lea.vmem (%p813_p8), %s925_s2, %s635_s10 }
  0x30   : > { %650 = vmatprep.mubr.msk.bf16.mxu1 %vm252_vm0, %v234_v9  ;;  %s606_s6 = sshll.u32 %s220_s5, 1 }
  0x31   : > { %645 = vmatpush3.bf16.msra.mxu0 %v706_v1  ;;  %657 = vmatpush3.bf16.msra.mxu1 %v706_v1  ;;  %s222_s9 = scalar_lea.vmem %s926_s3, %s606_s6 }
  0x34   : > { %647 = vmatmul.mubr.msk.bf16.vlgmr.msra.gmra.mrb[0].mxu0 %vm252_vm0, %v233_v12  ;;  %651 = vmatmul.mubr.msk.bf16.vlgmr.msra.gmra.mrb[0].mxu1 %vm252_vm0, %v235_v13 }
 0x107   : > { %v648_v14 = vpop.f32.mrb[0].mxu0  ;;  %v652_v15 = vpop.f32.mrb[0].mxu1 }
 0x108   : > { %v629_v16 = vpack.c.bf16 %v648_v14, %v648_v14  ;;  %v299_v17 = vpop.f32.mrb[1].mxu0  ;;  %v633_v18 = vpack.c.bf16 %v652_v15, %v652_v15  ;;  %v315_v19 = vpop.f32.mrb[1].mxu1  ;;  %v397_v24 = vmul.f32 %v648_v14, %v648_v14  ;;  %v375_v32 = vsel %vm371_vm2, %v648_v14, 0.0 }
 0x109   : > { %v627_v20 = vpack.c.bf16 %v299_v17, %v299_v17  ;;  %v395_v21 = vmul.f32 %v299_v17, %v299_v17  ;;  %v649_v22 = vpop.f32.mrb[2].mxu0  ;;  %v653_v23 = vpop.f32.mrb[2].mxu1  ;;  %v372_v28 = vsel %vm371_vm2, %v299_v17, 0.0  ;;  %v631_v35 = vpack.c.bf16 %v315_v19, %v315_v19 }
 0x10a   : > { %365 = vst.msk [vmem:[%s861_s4 + $0x8] sm:$0xf] %vm362_vm1, %v629_v16  ;;  %v630_v25 = vpack.c.bf16 %v649_v22, %v649_v22  ;;  %v302_v26 = vpop.f32.mrb[3].mxu0  ;;  %369 = vst.msk [vmem:[%s861_s4 + $0x18] sm:$0xf] %vm362_vm1, %v633_v18  ;;  %v318_v27 = vpop.f32.mrb[3].mxu1  ;;  %v398_v33 = vmul.f32 %v649_v22, %v649_v22  ;;  %v399_v38 = vmul.f32 %v315_v19, %v315_v19 }
 0x10b   : > { %363 = vst.msk [vmem:[%s861_s4] sm:$0xf] %vm362_vm1, %v627_v20  ;;  %v628_v29 = vpack.c.bf16 %v302_v26, %v302_v26  ;;  %v373_v30 = vsel %vm371_vm2, %v302_v26, 0.0  ;;  %v396_v31 = vmul.f32 %v302_v26, %v302_v26  ;;  %v403_v36 = vsel %vm371_vm2, %v395_v21, 0.0  ;;  %367 = vst.msk [vmem:[%s861_s4 + $0x10] sm:$0xf] %vm362_vm1, %v631_v35 }
 0x10c   : > { %366 = vst.msk [vmem:[%s861_s4 + $0xc] sm:$0xf] %vm362_vm1, %v630_v25  ;;  %v374_v34 = vadd.f32 %v373_v30, %v372_v28  ;;  %v634_v39 = vpack.c.bf16 %v653_v23, %v653_v23  ;;  %v406_v42 = vsel %vm371_vm2, %v397_v24, 0.0  ;;  %v377_v43 = vsel %vm371_vm2, %v649_v22, 0.0 }
 0x10d   : > { %364 = vst.msk [vmem:[%s861_s4 + $0x4] sm:$0xf] %vm362_vm1, %v628_v29  ;;  %v404_v37 = vsel %vm371_vm2, %v396_v31, 0.0  ;;  %v379_v44 = vsel %vm371_vm2, %v315_v19, 0.0  ;;  %v632_v45 = vpack.c.bf16 %v318_v27, %v318_v27  ;;  %v408_v48 = vsel %vm371_vm2, %v398_v33, 0.0 }
 0x10e   : > { %v376_v40 = vadd.f32 %v375_v32, %v374_v34  ;;  %v405_v41 = vadd.f32 %v404_v37, %v403_v36  ;;  %370 = vst.msk [vmem:[%s861_s4 + $0x1c] sm:$0xf] %vm362_vm1, %v634_v39  ;;  %v410_v49 = vsel %vm371_vm2, %v399_v38, 0.0  ;;  %v400_v50 = vmul.f32 %v318_v27, %v318_v27 }
 0x10f   : > { %368 = vst.msk [vmem:[%s861_s4 + $0x14] sm:$0xf] %vm362_vm1, %v632_v45  ;;  %v401_v53 = vmul.f32 %v652_v15, %v652_v15  ;;  %v381_v54 = vsel %vm371_vm2, %v318_v27, 0.0  ;;  %v383_v57 = vsel %vm371_vm2, %v652_v15, 0.0  ;;  %v402_v58 = vmul.f32 %v653_v23, %v653_v23 }
 0x110   : > { %v407_v46 = vadd.f32 %v406_v42, %v405_v41  ;;  %v378_v47 = vadd.f32 %v377_v43, %v376_v40  ;;  %v412_v59 = vsel %vm371_vm2, %v400_v50, 0.0  ;;  %v385_v63 = vsel %vm371_vm2, %v653_v23, 0.0 }
 0x111   : > { %v414_v62 = vsel %vm371_vm2, %v401_v53, 0.0  ;;  %v416_v2 = vsel %vm371_vm2, %v402_v58, 0.0 }
 0x112   : > { %v380_v51 = vadd.f32 %v379_v44, %v378_v47  ;;  %v409_v52 = vadd.f32 %v408_v48, %v407_v46 }
 0x113   : > { %v458_v17 = vld [vmem:[%s861_s4 + $0x8] sm:$0xff] (%p813_p8)  }
 0x114   : > { %v411_v55 = vadd.f32 %v410_v49, %v409_v52  ;;  %v382_v56 = vadd.f32 %v381_v54, %v380_v51  ;;  %v454_v16 = vld [vmem:[%s861_s4] sm:$0xff] (%p813_p8)   ;;  %459 = vst [vmem:[%s438_s18 + $0x10] sm:$0xff] (%p813_p8), %v458_v17  }
 0x115   : > { %v466_v19 = vld [vmem:[%s861_s4 + $0x18] sm:$0xff] (%p813_p8)   ;;  %455 = vst [vmem:[%s438_s18] sm:$0xff] (%p813_p8), %v454_v16  }
 0x116   : > { %v384_v60 = vadd.f32 %v383_v57, %v382_v56  ;;  %v413_v61 = vadd.f32 %v412_v59, %v411_v55  ;;  %v462_v18 = vld [vmem:[%s861_s4 + $0x10] sm:$0xff] (%p813_p8)   ;;  %467 = vst [vmem:[%s438_s18 + $0x30] sm:$0xff] (%p813_p8), %v466_v19  }
 0x117   : > { %463 = vst [vmem:[%s438_s18 + $0x20] sm:$0xff] (%p813_p8), %v462_v18  }
 0x118   : > { %v386_v0 = vadd.f32 %v385_v63, %v384_v60  ;;  %v415_v1 = vadd.f32 %v414_v62, %v413_v61 }
 0x11a   : > { %v387_v3 = vrot.slane %v386_v0, 4  ;;  %v417_v4 = vadd.f32 %v416_v2, %v415_v1 }
 0x11c   : > { %v388_v5 = vadd.f32 %v387_v3, %v386_v0  ;;  %v418_v6 = vrot.slane %v417_v4, 4 }
 0x11e   : > { %v389_v7 = vrot.slane %v388_v5, 2  ;;  %v419_v8 = vadd.f32 %v418_v6, %v417_v4 }
 0x120   : > { %v390_v9 = vadd.f32 %v389_v7, %v388_v5  ;;  %v420_v10 = vrot.slane %v419_v8, 2 }
 0x122   : > { %v391_v11 = vrot.slane %v390_v9, 1  ;;  %v421_v12 = vadd.f32 %v420_v10, %v419_v8  ;;  %435 = sbr.rel (!%p813_p8) target bundleno = 297 (0x129), region = 36 }
 0x124   : > { %v392_v13 = vadd.f32 %v391_v11, %v390_v9  ;;  %v422_v14 = vrot.slane %v421_v12, 1 }
 0x126   : > { %394 = vst.msk [vmem:[%s222_s9] sm:$0x1] %vm393_vm3, %v392_v13  ;;  %v423_v15 = vadd.f32 %v422_v14, %v421_v12 }
 0x128   : > { %424 = vst.msk [vmem:[%s222_s9 + $0x1] sm:$0x1] %vm393_vm3, %v423_v15 }
 0x129 PF: > { %p14_p0 = scmp.ge.s32.totalorder %s791_s17, 4   ;;  %s930_s12 = smov %s733_s13 }
 0x12a   : > { %s931_s13 = smov %s737_s14  ;;  %s932_s14 = smov %s801_s20 }
 0x12b   : > { %s933_s15 = smov %s791_s17  ;;  %16 = sbr.rel (!%p14_p0) target bundleno = 3 (0x3), region = 126 }
 0x132   :  { %528 = vsyncpa [#allocation3], 1 }
 0x133   :  { %530 = vsyncpa [#allocation3 + $0x1], 1 }

// kernel: _lambda_.5
= control target key start
LH: loop header
LB: loop body
LE: loop exit
PB: predicated region body
PF: predicated region fallthrough
CT: control target
= control target key end

     0   :  { %8 = vsyncpa [#allocation4], 0  ;;  %s755_s0 = inlined_call_operand.vmem [shape: bf16[4,32,32], index: 0, kind: input, shape index: {}]   ;;  %s756_s1 = inlined_call_operand.vmem [shape: f32[1,32], index: 1, kind: input, shape index: {}]   ;;  %s757_s2 = inlined_call_operand.vmem [shape: f32[1,32], index: 2, kind: input, shape index: {}]   ;;  %s758_s3 = inlined_call_operand.hbm [shape: f32[4,32,32], index: 3, kind: output, shape index: {}]  }
   0x1   :  { %10 = vsyncpa [#allocation4 + $0x1], 0  ;;  %s631_s12 = smov 0   ;;  %s633_s13 = smov 0  }
   0x2   :  { %s635_s14 = smov 0   ;;  %s637_s15 = smov 0  }
   0x3 LB: > { %s456_s16 = sadd.s32 4294967295, %s601_s15   ;;  %s457_s17 = sadd.s32 4294967294, %s601_s15   ;;  %s601_s15 = sphi %s637_s15, %s764_s15   ;;  %s597_s14 = sphi %s635_s14, %s763_s14   ;;  %s593_s13 = sphi %s633_s13, %s762_s13   ;;  %s589_s12 = sphi %s631_s12, %s761_s12  }
   0x4   : > { %s654_s18 = sadd.s32 1, %s601_s15   ;;  %s23_s19 = sadd.s32 1, %s597_s14 }
   0x5   : > { %s20_s20 = ssub.s32 %s601_s15, %s654_s18  ;;  %p30_p0 = scmp.ne.s32.totalorder %s597_s14, %s593_s13 }
   0x6   : > { %p21_p1 = scmp.eq.s32.totalorder %s20_s20, 0  ;;  %p31_p2 = scmp.eq.s32.totalorder %s601_s15, 0 }
   0x7   : > { %p102_p3 = scmp.eq.s32.totalorder %s456_s16, 1  ;;  %p107_p4 = scmp.ne.s32.totalorder %s593_s13, %s589_s12 }
   0x8   : > { %s667_s21 = scalar_select %p21_p1, %s597_s14, %s23_s19  }
   0x9   : > { %p32_p5 = por %p31_p2, %p30_p0  ;;  %p669_p6 = por %p102_p3, %p30_p0 }
   0xa   : > { %p108_p7 = scmp.eq.s32.totalorder %s457_s17, 1  ;;  %p459_p9 = scmp.ge.s32.totalorder %s601_s15, 2 }
   0xc   : > { %p673_p8 = por %p108_p7, %p107_p4  ;;  %130 = sbr.rel (%p459_p9) target bundleno = 26 (0x1a), region = 24 }
  0x13   : > { %133 = sbr.rel (!%p32_p5) target bundleno = 26 (0x1a), region = 28  ;;  %s135_s24 = sand.u32 (%p32_p5), 1, %s597_s14  }
  0x14   : > { %s493_s25 = sshll.u32 (%p32_p5), %s601_s15, 3  ;;  %s460_s26 = sshll.u32 (%p32_p5), %s135_s24, 5 }
  0x15   : > { %s140_s29 = scalar_lea.vmem (%p32_p5), %s755_s0, %s493_s25  ;;  %s137_s30 = scalar_lea.vmem (%p32_p5), [#allocation2], %s460_s26 }
  0x16   : > { %v156_v0 = vld [vmem:[%s140_s29] sm:$0xff] (%p32_p5)   ;;  %v160_v1 = vld [vmem:[%s140_s29 + $0x10] sm:$0xff] (%p32_p5)  }
  0x17   : > { %v164_v2 = vld [vmem:[%s140_s29 + $0x20] sm:$0xff] (%p32_p5)   ;;  %157 = vst [vmem:[%s137_s30] sm:$0xff] (%p32_p5), %v156_v0   ;;  %161 = vst [vmem:[%s137_s30 + $0x8] sm:$0xff] (%p32_p5), %v160_v1   ;;  %v168_v3 = vld [vmem:[%s140_s29 + $0x30] sm:$0xff] (%p32_p5)  }
  0x18   : > { %165 = vst [vmem:[%s137_s30 + $0x10] sm:$0xff] (%p32_p5), %v164_v2   ;;  %169 = vst [vmem:[%s137_s30 + $0x18] sm:$0xff] (%p32_p5), %v168_v3  }
  0x1a PF: > { %p463_p10 = scmp.ge.s32.totalorder %s601_s15, 1  ;;  %p209_p11 = scmp.lt.s32.totalorder %s601_s15, 3 }
  0x1c   : > { %p210_p12 = pnand %p463_p10, %p209_p11 }
  0x1d   : > { %s688_s4 = sand.u32 (!%p210_p12), 1, %s593_s13   ;;  %v466_v4 = vld [vmem:[%s756_s1] ss:$0 sm:$0xff] (!%p210_p12)  ;;  %vm271_vm0 = vcmask (!%p210_p12), 261120   ;;  %v603_v23 = vmov (!%p210_p12), 0.0  }
  0x1e   : > { %213 = sbr.rel (%p210_p12) target bundleno = 69 (0x45), region = 69  ;;  %s464_s5 = sshll.u32 (!%p210_p12), %s688_s4, 5  ;;  %v467_v11 = vld [vmem:[%s757_s2] ss:$0 sm:$0xff] (!%p210_p12) }
  0x1f   : > { %s218_s8 = scalar_lea.vmem (!%p210_p12), [#allocation2], %s464_s5  ;;  %s465_s11 = sshll.u32 (!%p210_p12), %s688_s4, 6 }
  0x20   : > { %v496_v5 = vld [vmem:[%s218_s8] sm:$0xff] (!%p210_p12)   ;;  %v511_v6 = vld [vmem:[%s218_s8 + $0x8] sm:$0xff] (!%p210_p12)   ;;  %v512_v12 = vld [vmem:[%s218_s8 + $0x10] sm:$0xff] (!%p210_p12)   ;;  %s698_s17 = scalar_lea.vmem (!%p210_p12), [#allocation3], %s465_s11  ;;  %s347_s19 = scalar_lea.sflag (!%p210_p12), [#allocation4], %s688_s4 }
  0x21   : > { %v497_v7 = vunpack.c.l.bf16 (!%p210_p12), %v496_v5  ;;  %v498_v8 = vunpack.c.h.bf16 (!%p210_p12), %v496_v5  ;;  %v501_v9 = vunpack.c.l.bf16 (!%p210_p12), %v511_v6  ;;  %v502_v10 = vunpack.c.h.bf16 (!%p210_p12), %v511_v6  ;;  %v513_v28 = vld [vmem:[%s218_s8 + $0x18] sm:$0xff] (!%p210_p12)  }
  0x22   : > { %v505_v19 = vunpack.c.l.bf16 (!%p210_p12), %v512_v12  ;;  %v506_v20 = vunpack.c.h.bf16 (!%p210_p12), %v512_v12  ;;  %v509_v35 = vunpack.c.l.bf16 (!%p210_p12), %v513_v28  ;;  %v510_v36 = vunpack.c.h.bf16 (!%p210_p12), %v513_v28 }
  0x23   : > { %v253_v13 = vmul.f32 (!%p210_p12), %v497_v7, %v466_v4  ;;  %v254_v14 = vmul.f32 (!%p210_p12), %v498_v8, %v466_v4  ;;  %v283_v15 = vmul.f32 (!%p210_p12), %v501_v9, %v466_v4  ;;  %v284_v16 = vmul.f32 (!%p210_p12), %v502_v10, %v466_v4 }
  0x24   : > { %v307_v31 = vmul.f32 (!%p210_p12), %v505_v19, %v466_v4  ;;  %v308_v32 = vmul.f32 (!%p210_p12), %v506_v20, %v466_v4  ;;  %v331_v45 = vmul.f32 (!%p210_p12), %v509_v35, %v466_v4  ;;  %v332_v46 = vmul.f32 (!%p210_p12), %v510_v36, %v466_v4 }
  0x25   : > { %v261_v17 = vadd.f32 %v467_v11, %v253_v13  ;;  %v262_v18 = vadd.f32 %v467_v11, %v254_v14  ;;  %v285_v21 = vadd.f32 %v467_v11, %v283_v15  ;;  %v286_v22 = vadd.f32 %v467_v11, %v284_v16 }
  0x26   : > { %v309_v37 = vadd.f32 %v467_v11, %v307_v31  ;;  %v310_v38 = vadd.f32 %v467_v11, %v308_v32  ;;  %v333_v49 = vadd.f32 %v467_v11, %v331_v45  ;;  %v334_v50 = vadd.f32 %v467_v11, %v332_v46 }
  0x27   : > { %vm265_vm1 = vcmp.ge.f32.partialorder %v261_v17, 1.0  ;;  %vm266_vm2 = vcmp.ge.f32.partialorder %v262_v18, 1.0 }
  0x28   : > { %v468_v24 = vsel %vm265_vm1, 1.0, %v603_v23  ;;  %v274_v25 = vsel %vm265_vm1, 0.0, %v261_v17  ;;  %v469_v26 = vsel %vm266_vm2, 1.0, %v603_v23  ;;  %v275_v27 = vsel %vm266_vm2, 0.0, %v262_v18 }
  0x29   : > { %272 = vst.msk [vmem:[%s698_s17] sm:$0xff] %vm271_vm0, %v468_v24  ;;  %v276_v29 = vmul.f32 0.5, %v274_v25  ;;  %273 = vst.msk [vmem:[%s698_s17 + $0x8] sm:$0xff] %vm271_vm0, %v469_v26  ;;  %v277_v30 = vmul.f32 0.5, %v275_v27 }
  0x2b   : > { %v287_v33 = vadd.f32 %v285_v21, %v276_v29  ;;  %v288_v34 = vadd.f32 %v286_v22, %v277_v30 }
  0x2d   : > { %vm289_vm3 = vcmp.ge.f32.partialorder %v287_v33, 1.0  ;;  %vm290_vm4 = vcmp.ge.f32.partialorder %v288_v34, 1.0 }
  0x2e   : > { %v472_v39 = vsel %vm289_vm3, 1.0, %v603_v23  ;;  %v298_v40 = vsel %vm289_vm3, 0.0, %v287_v33  ;;  %v473_v41 = vsel %vm290_vm4, 1.0, %v603_v23  ;;  %v299_v42 = vsel %vm290_vm4, 0.0, %v288_v34 }
  0x2f   : > { %474 = vst.msk [vmem:[%s698_s17 + $0x10] sm:$0xff] %vm271_vm0, %v472_v39  ;;  %v300_v43 = vmul.f32 0.5, %v298_v40  ;;  %475 = vst.msk [vmem:[%s698_s17 + $0x18] sm:$0xff] %vm271_vm0, %v473_v41  ;;  %v301_v44 = vmul.f32 0.5, %v299_v42 }
  0x31   : > { %v311_v47 = vadd.f32 %v309_v37, %v300_v43  ;;  %v312_v48 = vadd.f32 %v310_v38, %v301_v44 }
  0x33   : > { %vm313_vm5 = vcmp.ge.f32.partialorder %v311_v47, 1.0  ;;  %vm314_vm6 = vcmp.ge.f32.partialorder %v312_v48, 1.0 }
  0x34   : > { %v478_v51 = vsel %vm313_vm5, 1.0, %v603_v23  ;;  %v322_v52 = vsel %vm313_vm5, 0.0, %v311_v47  ;;  %v479_v53 = vsel %vm314_vm6, 1.0, %v603_v23  ;;  %v323_v54 = vsel %vm314_vm6, 0.0, %v312_v48 }
  0x35   : > { %480 = vst.msk [vmem:[%s698_s17 + $0x20] sm:$0xff] %vm271_vm0, %v478_v51  ;;  %v324_v55 = vmul.f32 0.5, %v322_v52  ;;  %481 = vst.msk [vmem:[%s698_s17 + $0x28] sm:$0xff] %vm271_vm0, %v479_v53  ;;  %v325_v56 = vmul.f32 0.5, %v323_v54 }
  0x37   : > { %v335_v57 = vadd.f32 %v333_v49, %v324_v55  ;;  %v336_v58 = vadd.f32 %v334_v50, %v325_v56 }
  0x39   : > { %vm337_vm7 = vcmp.ge.f32.partialorder %v335_v57, 1.0  ;;  %vm338_vm8 = vcmp.ge.f32.partialorder %v336_v58, 1.0 }
  0x3a   : > { %v484_v59 = vsel %vm337_vm7, 1.0, %v603_v23  ;;  %v485_v60 = vsel %vm338_vm8, 1.0, %v603_v23 }
  0x3b   : > { %486 = vst.msk [vmem:[%s698_s17 + $0x30] sm:$0xff] %vm271_vm0, %v484_v59  ;;  %487 = vst.msk [vmem:[%s698_s17 + $0x38] sm:$0xff] %vm271_vm0, %v485_v60 }
  0x3c   : > { %s494_s20 = sshll.u32 %s456_s16, 8  ;;  %s376_s24 = sshll.u32 %s698_s17, 4  ;;  %s377_s24 = int_to_ptr.vmem [resolvable:$true] %s376_s24 }
  0x3d   : > { %s359_s27 = scalar_lea.hbm %s758_s3, %s494_s20  ;;  %s604_s28 = smov 256  }
  0x3e   : > { %514 = sst [smem:[#allocation6]] (%p669_p6), %s604_s28  ;;  %s605_s29 = smov 512  }
  0x3f   : > { %515 = sst [smem:[#allocation6 + $0x1]] (%p669_p6), %s605_s29  ;;  %s606_s30 = smov 2  }
  0x40   : > { %516 = sst [smem:[#allocation6 + $0x2]] (%p669_p6), %s606_s30  ;;  %s607_s4 = smov 128  }
  0x41   : > { %517 = sst [smem:[#allocation6 + $0x3]] (%p669_p6), %s607_s4  ;;  %s608_s16 = smov 8  }
  0x42   : > { %518 = sst [smem:[#allocation6 + $0x4]] (%p669_p6), %s607_s4  ;;  %s609_s5 = smov [#allocation5]  }
  0x43   : > { %519 = sst [smem:[#allocation6 + $0x5]] (%p669_p6), %s608_s16  ;;  %s610_s6 = smov 0  }
  0x44   : > { %520 = dma.general (%p669_p6), %s377_s24, 1024, %s359_s27, %s347_s19, %s609_s5, [#allocation6], %s610_s6, 0  }
  0x45 PF: > { %s404_s7 = sand.u32 1, %s589_s12   ;;  %p523_p13 = pnand %p459_p9, %p673_p8 }
  0x46   : > { %s405_s8 = scalar_lea.sflag [#allocation4], %s404_s7 }
  0x47   : > { %584 = dma.done.wait (!%p523_p13), %s405_s8, 1024  }
  0x48   : > { %586 = vsyncadd (!%p523_p13), %s405_s8, 4294966272  ;;  %p13_p0 = scmp.ge.s32.totalorder %s654_s18, 4   ;;  %s761_s12 = smov %s593_s13 }
  0x49   : > { %s762_s13 = smov %s597_s14  ;;  %s763_s14 = smov %s667_s21 }
  0x4a   : > { %s764_s15 = smov %s654_s18  ;;  %15 = sbr.rel (!%p13_p0) target bundleno = 3 (0x3), region = 124 }
  0x51   :  { %410 = vsyncpa [#allocation4], 1 }
  0x52   :  { %412 = vsyncpa [#allocation4 + $0x1], 1 }

// kernel: _lambda_.4
= control target key start
LH: loop header
LB: loop body
LE: loop exit
PB: predicated region body
PF: predicated region fallthrough
CT: control target
= control target key end

     0   :  { %s973_s18 = smov 0   ;;  %s975_s19 = smov 0   ;;  %s1126_s0 = inlined_call_operand.vmem [shape: bf16[4,32,64], index: 0, kind: input, shape index: {}]   ;;  %s1127_s1 = inlined_call_operand.vmem [shape: f32[1,64], index: 1, kind: input, shape index: {}]   ;;  %s1128_s2 = inlined_call_operand.vmem [shape: f32[1,64], index: 2, kind: input, shape index: {}]   ;;  %s1129_s3 = inlined_call_operand.vmem [shape: bf16[64,32], index: 3, kind: input, shape index: {}]   ;;  %s1130_s4 = inlined_call_operand.vmem [shape: bf16[4,32,32], index: 4, kind: output, shape index: {0}]   ;;  %s1131_s5 = inlined_call_operand.vmem [shape: f32[2,2,32], index: 5, kind: output, shape index: {1}]  }
   0x1   :  { %s977_s20 = smov 0  }
   0x2 LB: > { %s989_s21 = sadd.s32 4294967295, %s940_s20   ;;  %s992_s22 = sadd.s32 1, %s940_s20   ;;  %s940_s20 = sphi %s977_s20, %s1135_s20   ;;  %s936_s19 = sphi %s975_s19, %s1134_s19   ;;  %s932_s18 = sphi %s973_s18, %s1133_s18  }
   0x3   : > { %s20_s23 = ssub.s32 %s940_s20, %s992_s22  ;;  %s23_s24 = sadd.s32 1, %s936_s19 }
   0x4   : > { %p21_p0 = scmp.eq.s32.totalorder %s20_s23, 0  ;;  %p30_p1 = scmp.ne.s32.totalorder %s936_s19, %s932_s18 }
   0x5   : > { %p31_p2 = scmp.eq.s32.totalorder %s940_s20, 0  ;;  %p123_p3 = scmp.eq.s32.totalorder %s989_s21, 1 }
   0x6   : > { %s1002_s25 = scalar_select %p21_p0, %s936_s19, %s23_s24  }
   0x7   : > { %p32_p4 = por %p31_p2, %p30_p1  ;;  %p1004_p5 = por %p123_p3, %p30_p1 }
   0x8   : > { %p783_p6 = scmp.ge.s32.totalorder %s940_s20, 2 }
   0xa   : > { %180 = sbr.rel (%p783_p6) target bundleno = 24 (0x18), region = 28 }
  0x11   : > { %183 = sbr.rel (!%p32_p4) target bundleno = 24 (0x18), region = 32  ;;  %s185_s27 = sand.u32 (%p32_p4), 1, %s936_s19  }
  0x12   : > { %s828_s28 = sshll.u32 (%p32_p4), %s940_s20, 3  ;;  %s784_s29 = sshll.u32 (%p32_p4), %s185_s27, 5 }
  0x13   : > { %s190_s7 = scalar_lea.vmem (%p32_p4), %s1126_s0, %s828_s28  ;;  %s187_s8 = scalar_lea.vmem (%p32_p4), [#allocation3], %s784_s29 }
  0x14   : > { %v206_v0 = vld [vmem:[%s190_s7] sm:$0xff] (%p32_p4)   ;;  %v210_v1 = vld [vmem:[%s190_s7 + $0x10] sm:$0xff] (%p32_p4)  }
  0x15   : > { %v214_v2 = vld [vmem:[%s190_s7 + $0x20] sm:$0xff] (%p32_p4)   ;;  %207 = vst [vmem:[%s187_s8] sm:$0xff] (%p32_p4), %v206_v0   ;;  %211 = vst [vmem:[%s187_s8 + $0x8] sm:$0xff] (%p32_p4), %v210_v1   ;;  %v218_v3 = vld [vmem:[%s190_s7 + $0x30] sm:$0xff] (%p32_p4)  }
  0x16   : > { %215 = vst [vmem:[%s187_s8 + $0x10] sm:$0xff] (%p32_p4), %v214_v2   ;;  %219 = vst [vmem:[%s187_s8 + $0x18] sm:$0xff] (%p32_p4), %v218_v3  }
  0x18 PF: > { %p787_p7 = scmp.ge.s32.totalorder %s940_s20, 1  ;;  %p259_p8 = scmp.lt.s32.totalorder %s940_s20, 3 }
  0x1a   : > { %p260_p9 = pnand %p787_p7, %p259_p8 }
  0x1b   : > { %v914_v4 = vld [vmem:[%s1129_s3] sm:$0xff] (!%p260_p9)   ;;  %s266_s11 = sand.u32 (!%p260_p9), 1, %s932_s18   ;;  %v915_v5 = vld [vmem:[%s1129_s3 + $0x8] sm:$0xff] (!%p260_p9)   ;;  %v916_v6 = vld [vmem:[%s1129_s3 + $0x10] sm:$0xff] (!%p260_p9)   ;;  %vm334_vm0 = vcmask (!%p260_p9), 523264   ;;  %v942_v30 = vmov (!%p260_p9), 0.0  }
  0x1c   : > { %263 = sbr.rel (%p260_p9) target bundleno = 304 (0x130), region = 73  ;;  %s1023_s14 = sshll.u32 (!%p260_p9), %s266_s11, 5  ;;  %865 = vmatprep.subr.bf16.mxu0 (!%p260_p9), %v914_v4  ;;  %881 = vmatprep.subr.bf16.mxu1 (!%p260_p9), %v914_v4  ;;  %v1031_v7 = vld [vmem:[%s1127_s1] ss:$0 sm:$0xff] (!%p260_p9)  ;;  %v917_v20 = vld [vmem:[%s1129_s3 + $0x18] sm:$0xff] (!%p260_p9)   ;;  %vm562_vm9 = vcmask (!%p260_p9), 261120  }
  0x1d   : > { %866 = vmatpush3.bf16.msra.mxu0 (!%p260_p9), %v914_v4  ;;  %885 = vmatpush3.bf16.msra.mxu1 (!%p260_p9), %v914_v4  ;;  %s268_s18 = scalar_lea.vmem (!%p260_p9), [#allocation3], %s1023_s14  ;;  %v1037_v13 = vld [vmem:[%s1128_s2] ss:$0 sm:$0xff] (!%p260_p9)  ;;  %vm553_vm10 = vcmask (!%p260_p9), 257024   ;;  %s1068_s29 = scalar_lea.vmem (!%p260_p9), [#allocation4], %s1023_s14  ;;  %vm584_vm11 = vcmask (!%p260_p9), 253952  }
  0x1e   : > { %867 = vmatprep.subr.bf16.mxu0 (!%p260_p9), %v915_v5  ;;  %v839_v8 = vld [vmem:[%s268_s18] sm:$0xff] (!%p260_p9)   ;;  %882 = vmatprep.subr.bf16.mxu1 (!%p260_p9), %v915_v5  ;;  %v854_v11 = vld [vmem:[%s268_s18 + $0x8] sm:$0xff] (!%p260_p9)   ;;  %v855_v12 = vld [vmem:[%s268_s18 + $0x10] sm:$0xff] (!%p260_p9)   ;;  %p298_p10 = scmp.lt.s32.totalorder (!%p260_p9), %s989_s21, 1 }
  0x1f   : > { %v840_v9 = vunpack.c.l.bf16 (!%p260_p9), %v839_v8  ;;  %v841_v10 = vunpack.c.h.bf16 (!%p260_p9), %v839_v8  ;;  %v844_v14 = vunpack.c.l.bf16 (!%p260_p9), %v854_v11  ;;  %v845_v15 = vunpack.c.h.bf16 (!%p260_p9), %v854_v11  ;;  %v856_v19 = vld [vmem:[%s268_s18 + $0x18] sm:$0xff] (!%p260_p9)  }
  0x20   : > { %v848_v16 = vunpack.c.l.bf16 (!%p260_p9), %v855_v12  ;;  %v849_v25 = vunpack.c.h.bf16 (!%p260_p9), %v855_v12  ;;  %v852_v27 = vunpack.c.l.bf16 (!%p260_p9), %v856_v19  ;;  %v853_v41 = vunpack.c.h.bf16 (!%p260_p9), %v856_v19 }
  0x21   : > { %868 = vmatpush3.bf16.msra.mxu0 (!%p260_p9), %v915_v5  ;;  %v315_v17 = vmul.f32 (!%p260_p9), %v840_v9, %v1031_v7  ;;  %v316_v18 = vmul.f32 (!%p260_p9), %v841_v10, %v1031_v7  ;;  %886 = vmatpush3.bf16.msra.mxu1 (!%p260_p9), %v915_v5  ;;  %v345_v21 = vmul.f32 (!%p260_p9), %v844_v14, %v1031_v7 }
  0x22   : > { %869 = vmatprep.subr.bf16.mxu0 (!%p260_p9), %v916_v6  ;;  %v346_v22 = vmul.f32 (!%p260_p9), %v845_v15, %v1031_v7  ;;  %883 = vmatprep.subr.bf16.mxu1 (!%p260_p9), %v916_v6  ;;  %v369_v26 = vmul.f32 (!%p260_p9), %v848_v16, %v1031_v7  ;;  %v370_v38 = vmul.f32 (!%p260_p9), %v849_v25, %v1031_v7 }
  0x23   : > { %v323_v23 = vadd.f32 %v1037_v13, %v315_v17  ;;  %v324_v24 = vadd.f32 %v1037_v13, %v316_v18  ;;  %v347_v28 = vadd.f32 %v1037_v13, %v345_v21  ;;  %v393_v42 = vmul.f32 %v852_v27, %v1031_v7  ;;  %s299_s30 = scalar_select %p298_p10, %s989_s21, 1 }
  0x24   : > { %v348_v29 = vadd.f32 %v1037_v13, %v346_v22  ;;  %v371_v43 = vadd.f32 %v1037_v13, %v369_v26  ;;  %v372_v44 = vadd.f32 %v1037_v13, %v370_v38  ;;  %v394_v52 = vmul.f32 %v853_v41, %v1031_v7  ;;  %s837_s10 = sshll.u32 (%p1004_p5), %s989_s21, 3 }
  0x25   : > { %870 = vmatpush3.bf16.msra.mxu0 %v916_v6  ;;  %vm327_vm1 = vcmp.ge.f32.partialorder %v323_v23, 1.0  ;;  %vm328_vm2 = vcmp.ge.f32.partialorder %v324_v24, 1.0  ;;  %887 = vmatpush3.bf16.msra.mxu1 %v916_v6  ;;  %v395_v56 = vadd.f32 %v1037_v13, %v393_v42  ;;  %s790_s6 = sshll.u32 %s299_s30, 1  ;;  %s629_s13 = scalar_lea.vmem (%p1004_p5), %s1130_s4, %s837_s10 }
  0x26   : > { %871 = vmatprep.subr.bf16.mxu0 %v917_v20  ;;  %v793_v31 = vsel %vm327_vm1, 1.0, %v942_v30  ;;  %v794_v32 = vsel %vm328_vm2, 1.0, %v942_v30  ;;  %v336_v33 = vsel %vm327_vm1, 0.0, %v323_v23  ;;  %v337_v34 = vsel %vm328_vm2, 0.0, %v324_v24  ;;  %884 = vmatprep.subr.bf16.mxu1 %v917_v20  ;;  %s301_s9 = scalar_lea.vmem %s1131_s5, %s790_s6 }
  0x27   : > { %v333_v35 = vpack.c.bf16 %v794_v32, %v793_v31  ;;  %v338_v36 = vmul.f32 0.5, %v336_v33  ;;  %v339_v37 = vmul.f32 0.5, %v337_v34  ;;  %v396_v57 = vadd.f32 %v1037_v13, %v394_v52 }
  0x29   : > { %872 = vmatpush3.bf16.msra.mxu0 %v917_v20  ;;  %335 = vst.msk [vmem:[#allocation2] sm:$0xff] %vm334_vm0, %v333_v35  ;;  %v349_v39 = vadd.f32 %v347_v28, %v338_v36  ;;  %v350_v40 = vadd.f32 %v348_v29, %v339_v37  ;;  %888 = vmatpush3.bf16.msra.mxu1 %v917_v20 }
  0x2b   : > { %vm351_vm3 = vcmp.ge.f32.partialorder %v349_v39, 1.0  ;;  %vm352_vm4 = vcmp.ge.f32.partialorder %v350_v40, 1.0 }
  0x2c   : > { %v797_v45 = vsel %vm351_vm3, 1.0, %v942_v30  ;;  %v798_v46 = vsel %vm352_vm4, 1.0, %v942_v30  ;;  %v360_v47 = vsel %vm351_vm3, 0.0, %v349_v39  ;;  %v361_v48 = vsel %vm352_vm4, 0.0, %v350_v40 }
  0x2d   : > { %v357_v49 = vpack.c.bf16 %v798_v46, %v797_v45  ;;  %v362_v50 = vmul.f32 0.5, %v360_v47  ;;  %v363_v51 = vmul.f32 0.5, %v361_v48 }
  0x2f   : > { %359 = vst.msk [vmem:[#allocation2 + $0x8] sm:$0xff] %vm334_vm0, %v357_v49  ;;  %v373_v53 = vadd.f32 %v371_v43, %v362_v50  ;;  %v374_v54 = vadd.f32 %v372_v44, %v363_v51 }
  0x30   : > { %v408_v55 = vld [vmem:[#allocation2] sm:$0xff] }
  0x31   : > { %vm375_vm5 = vcmp.ge.f32.partialorder %v373_v53, 1.0  ;;  %vm376_vm6 = vcmp.ge.f32.partialorder %v374_v54, 1.0  ;;  %873 = vmatprep.mubr.msk.bf16.mxu0 %vm334_vm0, %v408_v55 }
  0x32   : > { %v801_v58 = vsel %vm375_vm5, 1.0, %v942_v30  ;;  %v802_v59 = vsel %vm376_vm6, 1.0, %v942_v30  ;;  %v384_v60 = vsel %vm375_vm5, 0.0, %v373_v53  ;;  %v385_v61 = vsel %vm376_vm6, 0.0, %v374_v54 }
  0x33   : > { %v381_v62 = vpack.c.bf16 %v802_v59, %v801_v58  ;;  %v386_v63 = vmul.f32 0.5, %v384_v60  ;;  %v387_v0 = vmul.f32 0.5, %v385_v61 }
  0x35   : > { %383 = vst.msk [vmem:[#allocation2 + $0x10] sm:$0xff] %vm334_vm0, %v381_v62  ;;  %v397_v1 = vadd.f32 %v395_v56, %v386_v63  ;;  %v398_v2 = vadd.f32 %v396_v57, %v387_v0 }
  0x36   : > { %v409_v3 = vld [vmem:[#allocation2 + $0x8] sm:$0xff] }
  0x37   : > { %vm399_vm7 = vcmp.ge.f32.partialorder %v397_v1, 1.0  ;;  %vm400_vm8 = vcmp.ge.f32.partialorder %v398_v2, 1.0  ;;  %874 = vmatmul.mubr.msk.bf16.vlgmr.msra.gmra.mrb[0].mxu0 %vm334_vm0, %v409_v3 }
  0x38   : > { %v805_v4 = vsel %vm399_vm7, 1.0, %v942_v30  ;;  %v806_v5 = vsel %vm400_vm8, 1.0, %v942_v30 }
  0x39   : > { %v405_v6 = vpack.c.bf16 %v806_v5, %v805_v4 }
  0x3b   : > { %407 = vst.msk [vmem:[#allocation2 + $0x18] sm:$0xff] %vm334_vm0, %v405_v6 }
  0x3c   : > { %v410_v7 = vld [vmem:[#allocation2 + $0x10] sm:$0xff] }
  0x3d   : > { %877 = vmatprep.mubr.msk.bf16.mxu1 %vm334_vm0, %v410_v7 }
  0x42   : > { %v411_v8 = vld [vmem:[#allocation2 + $0x18] sm:$0xff] }
  0x43   : > { %878 = vmatmul.mubr.msk.bf16.vlgmr.msra.gmra.mrb[0].mxu1 %vm334_vm0, %v411_v8 }
 0x10a   : > { %v875_v9 = vpop.f32.mrb[0].mxu0 }
 0x10b   : > { %v831_v10 = vpack.c.bf16 %v875_v9, %v875_v9  ;;  %v490_v11 = vpop.f32.mrb[1].mxu0  ;;  %v588_v12 = vmul.f32 %v875_v9, %v875_v9  ;;  %v566_v17 = vsel %vm562_vm9, %v875_v9, 0.0 }
 0x10c   : > { %v829_v13 = vpack.c.bf16 %v490_v11, %v490_v11  ;;  %v563_v14 = vsel %vm562_vm9, %v490_v11, 0.0  ;;  %v586_v15 = vmul.f32 %v490_v11, %v490_v11  ;;  %v876_v16 = vpop.f32.mrb[2].mxu0 }
 0x10d   : > { %556 = vst.msk [vmem:[%s1068_s29 + $0x8] sm:$0xf] %vm553_vm10, %v831_v10  ;;  %v832_v18 = vpack.c.bf16 %v876_v16, %v876_v16  ;;  %v493_v19 = vpop.f32.mrb[3].mxu0  ;;  %v597_v25 = vsel %vm562_vm9, %v588_v12, 0.0  ;;  %v589_v26 = vmul.f32 %v876_v16, %v876_v16  ;;  %v568_v30 = vsel %vm562_vm9, %v876_v16, 0.0 }
 0x10e   : > { %554 = vst.msk [vmem:[%s1068_s29] sm:$0xf] %vm553_vm10, %v829_v13  ;;  %v594_v20 = vsel %vm562_vm9, %v586_v15, 0.0  ;;  %v830_v21 = vpack.c.bf16 %v493_v19, %v493_v19  ;;  %v564_v22 = vsel %vm562_vm9, %v493_v19, 0.0  ;;  %v587_v23 = vmul.f32 %v493_v19, %v493_v19 }
 0x10f   : > { %557 = vst.msk [vmem:[%s1068_s29 + $0xc] sm:$0xf] %vm553_vm10, %v832_v18  ;;  %v565_v24 = vadd.f32 %v564_v22, %v563_v14  ;;  %v599_v33 = vsel %vm562_vm9, %v589_v26, 0.0 }
 0x110   : > { %555 = vst.msk [vmem:[%s1068_s29 + $0x4] sm:$0xf] %vm553_vm10, %v830_v21  ;;  %v595_v27 = vsel %vm562_vm9, %v587_v23, 0.0 }
 0x111   : > { %v567_v28 = vadd.f32 %v566_v17, %v565_v24  ;;  %v596_v29 = vadd.f32 %v595_v27, %v594_v20 }
 0x113   : > { %v598_v31 = vadd.f32 %v597_v25, %v596_v29  ;;  %v569_v32 = vadd.f32 %v568_v30, %v567_v28 }
 0x115   : > { %v600_v34 = vadd.f32 %v599_v33, %v598_v31 }
 0x116   : > { %v879_v35 = vpop.f32.mrb[0].mxu1  ;;  %v649_v12 = vld [vmem:[%s1068_s29 + $0x8] sm:$0xff] (%p1004_p5)  }
 0x117   : > { %v835_v36 = vpack.c.bf16 %v879_v35, %v879_v35  ;;  %v506_v37 = vpop.f32.mrb[1].mxu1  ;;  %v592_v48 = vmul.f32 %v879_v35, %v879_v35  ;;  %v574_v52 = vsel %vm562_vm9, %v879_v35, 0.0  ;;  %v645_v11 = vld [vmem:[%s1068_s29] sm:$0xff] (%p1004_p5)   ;;  %650 = vst [vmem:[%s629_s13 + $0x10] sm:$0xff] (%p1004_p5), %v649_v12  }
 0x118   : > { %v833_v38 = vpack.c.bf16 %v506_v37, %v506_v37  ;;  %v570_v39 = vsel %vm562_vm9, %v506_v37, 0.0  ;;  %v590_v40 = vmul.f32 %v506_v37, %v506_v37  ;;  %v880_v41 = vpop.f32.mrb[2].mxu1  ;;  %646 = vst [vmem:[%s629_s13] sm:$0xff] (%p1004_p5), %v645_v11  }
 0x119   : > { %560 = vst.msk [vmem:[%s1068_s29 + $0x18] sm:$0xf] %vm553_vm10, %v835_v36  ;;  %v571_v42 = vadd.f32 %v570_v39, %v569_v32  ;;  %v836_v43 = vpack.c.bf16 %v880_v41, %v880_v41  ;;  %v509_v44 = vpop.f32.mrb[3].mxu1  ;;  %v593_v53 = vmul.f32 %v880_v41, %v880_v41  ;;  %v576_v56 = vsel %vm562_vm9, %v880_v41, 0.0 }
 0x11a   : > { %558 = vst.msk [vmem:[%s1068_s29 + $0x10] sm:$0xf] %vm553_vm10, %v833_v38  ;;  %v601_v45 = vsel %vm562_vm9, %v590_v40, 0.0  ;;  %v834_v46 = vpack.c.bf16 %v509_v44, %v509_v44  ;;  %v572_v47 = vsel %vm562_vm9, %v509_v44, 0.0  ;;  %v591_v51 = vmul.f32 %v509_v44, %v509_v44 }
 0x11b   : > { %v602_v49 = vadd.f32 %v601_v45, %v600_v34  ;;  %561 = vst.msk [vmem:[%s1068_s29 + $0x1c] sm:$0xf] %vm553_vm10, %v836_v43  ;;  %v573_v50 = vadd.f32 %v572_v47, %v571_v42  ;;  %v605_v58 = vsel %vm562_vm9, %v592_v48, 0.0  ;;  %v607_v61 = vsel %vm562_vm9, %v593_v53, 0.0 }
 0x11c   : > { %559 = vst.msk [vmem:[%s1068_s29 + $0x14] sm:$0xf] %vm553_vm10, %v834_v46  ;;  %v603_v55 = vsel %vm562_vm9, %v591_v51, 0.0 }
 0x11d   : > { %v575_v54 = vadd.f32 %v574_v52, %v573_v50  ;;  %v604_v57 = vadd.f32 %v603_v55, %v602_v49 }
 0x11f   : > { %v577_v59 = vadd.f32 %v576_v56, %v575_v54  ;;  %v606_v60 = vadd.f32 %v605_v58, %v604_v57 }
 0x121   : > { %v578_v62 = vrot.slane %v577_v59, 4  ;;  %v608_v63 = vadd.f32 %v607_v61, %v606_v60 }
 0x122   : > { %v657_v14 = vld [vmem:[%s1068_s29 + $0x18] sm:$0xff] (%p1004_p5)  }
 0x123   : > { %v579_v0 = vadd.f32 %v578_v62, %v577_v59  ;;  %v609_v1 = vrot.slane %v608_v63, 4  ;;  %v653_v13 = vld [vmem:[%s1068_s29 + $0x10] sm:$0xff] (%p1004_p5)   ;;  %658 = vst [vmem:[%s629_s13 + $0x30] sm:$0xff] (%p1004_p5), %v657_v14  }
 0x124   : > { %654 = vst [vmem:[%s629_s13 + $0x20] sm:$0xff] (%p1004_p5), %v653_v13  }
 0x125   : > { %v580_v2 = vrot.slane %v579_v0, 2  ;;  %v610_v3 = vadd.f32 %v609_v1, %v608_v63 }
 0x127   : > { %v581_v4 = vadd.f32 %v580_v2, %v579_v0  ;;  %v611_v5 = vrot.slane %v610_v3, 2 }
 0x129   : > { %v582_v6 = vrot.slane %v581_v4, 1  ;;  %v612_v7 = vadd.f32 %v611_v5, %v610_v3  ;;  %626 = sbr.rel (!%p1004_p5) target bundleno = 304 (0x130), region = 81 }
 0x12b   : > { %v583_v8 = vadd.f32 %v582_v6, %v581_v4  ;;  %v613_v9 = vrot.slane %v612_v7, 1 }
 0x12d   : > { %585 = vst.msk [vmem:[%s301_s9] sm:$0x1] %vm584_vm11, %v583_v8  ;;  %v614_v10 = vadd.f32 %v613_v9, %v612_v7 }
 0x12f   : > { %615 = vst.msk [vmem:[%s301_s9 + $0x1] sm:$0x1] %vm584_vm11, %v614_v10 }
 0x130 PF: > { %p13_p11 = scmp.ge.s32.totalorder %s992_s22, 4   ;;  %s1133_s18 = smov %s936_s19 }
 0x131   : > { %s1134_s19 = smov %s1002_s25  ;;  %s1135_s20 = smov %s992_s22 }
 0x132   :  { %15 = sbr.rel (!%p13_p11) target bundleno = 2 (0x2), region = 171 }

</bundles_post_ra>
